<compile_context>
chip_gen: v6e
topology: v6e:2x2x1
jax: 0.10.0
libtpu: 0.0.40
codegen_flags: <defaults>
</compile_context>

<pallas_src>
import functools

import jax
import jax.numpy as jnp
from jax import lax
from jax.experimental import pallas as pl
from jax.experimental.pallas import tpu as pltpu


# -----------------------------------------------------------------------------
# P4 group-conv weight expansion (glue).
# TODO(synk): rotation direction follows the standard p4 gconv convention
# (spatial rot90 by s, cyclic shift of the input-rotation axis); GrouPy's exact
# index tables are not re-derived here.
# -----------------------------------------------------------------------------
def expand_p4_weight(w):
    # w: (Cout, Cin, 4, k, k) -> (Cout*4, Cin*4, k, k)
    # output channel ordering (o, s) -> o*4 + s ; input ordering (i, r) -> i*4 + r
    Cout, Cin, _, k, _ = w.shape
    ws = []
    for s in range(4):
        w_shift = jnp.roll(w, shift=s, axis=2)          # [..., r, ...] = w[..., (r-s)%4, ...]
        w_rot = jnp.rot90(w_shift, k=s, axes=(-2, -1))  # spatial rotation by s*90deg
        ws.append(w_rot)
    tw = jnp.stack(ws, axis=1)                          # (Cout, 4, Cin, 4, k, k)
    return tw.reshape(Cout * 4, Cin * 4, k, k)


# -----------------------------------------------------------------------------
# Pallas kernel 1: fused im2col GEMM for the group conv (+ bias + BN partial stats).
# Per grid step (one conv instance g = b*in_caps + ic):
#   x_ref  : ((Hp+1)*Wp, Cin)  padded, channels-last, flattened activation (f32)
#   w_ref  : (k*k, Cin, Npad)  tap-major weight matrix (bf16), Npad = 128-padded cols
#   b_ref  : (1, Npad)         per-column bias (f32)
#   y_ref  : (Ho1*Wp, Npad)    stride-1 conv output on the padded row grid (f32)
#   stats  : (2, Npad)         masked per-column [sum ; sum of squares] for BN
# Flat-offset trick: out[q] = sum_t x[q + kh*Wp + kw] @ W_t for q = ho*Wp + wo;
# columns with wo >= Wo1 are garbage (masked out of the stats, cropped in glue).
# -----------------------------------------------------------------------------
def _p4conv_gemm_kernel(x_ref, w_ref, b_ref, y_ref, stats_ref, *, k, wp, wo_valid):
    msp, npad = y_ref.shape
    acc = jnp.zeros((msp, npad), jnp.float32)
    for t in range(k * k):
        kh, kw = divmod(t, k)
        off = kh * wp + kw
        a = x_ref[off:off + msp, :].astype(jnp.bfloat16)       # (msp, Cin) bf16
        acc = acc + jnp.dot(a, w_ref[t], preferred_element_type=jnp.float32)
    y = acc + b_ref[...]                                       # conv bias
    y_ref[...] = y

    # masked BatchNorm partial sums (only valid output columns wo < wo_valid)
    rid = lax.broadcasted_iota(jnp.int32, (msp, 1), 0)
    valid = (rid % wp) < wo_valid
    yv = jnp.where(valid, y, 0.0)
    stats_ref[0:1, :] = jnp.sum(yv, axis=0, keepdims=True)
    stats_ref[1:2, :] = jnp.sum(yv * yv, axis=0, keepdims=True)


# -----------------------------------------------------------------------------
# Pallas kernel 2: degree routing + squash.
# Block per (out_caps, lane-tile) grid point: pred block (in_caps, 4, out_dim, tL)
# with tL lanes = a chunk of the fused (batch * Ho * Wo) axis.
# -----------------------------------------------------------------------------
def _degree_routing_kernel(p_ref, o_ref):
    eps = 1e-8
    A = p_ref[...]                                             # (IC, 4, OD, tL) f32

    # rowsum_i = sum_j <A_i, A_j> / max(||A_i||^2, eps)  ==  <A_i, S> / max(||A_i||^2, eps)
    S = jnp.sum(A, axis=0, keepdims=True)                      # (1, 4, OD, tL)
    dots = jnp.sum(A * S, axis=2, keepdims=True)               # (IC, 4, 1, tL)
    nsq = jnp.maximum(jnp.sum(A * A, axis=2, keepdims=True), eps)
    rowsum = dots / nsq                                        # exact divide (ill-conditioned)

    # softmax over in_caps
    m = jnp.max(rowsum, axis=0, keepdims=True)
    e = jnp.exp(rowsum - m)
    denom = jnp.sum(e, axis=0, keepdims=True)
    score = e * pl.reciprocal(denom, approx=True)              # (IC, 4, 1, tL)

    # s = sum_i score_i * A_i, then squash along the rotation (size-4) axis
    s = jnp.sum(score * A, axis=0)                             # (4, OD, tL)
    nsq2 = jnp.sum(s * s, axis=0, keepdims=True)               # (1, OD, tL)
    nrm = jnp.sqrt(nsq2)
    scale = nsq2 * pl.reciprocal((1.0 + nsq2) * (nrm + 1e-8), approx=True)
    o_ref[...] = scale * s


def pallas_degree_routing(pk):
    # pk: (out_caps, in_caps, 4, out_dim, L) with L = batch * Ho * Wo
    OC, IC, R, OD, L = pk.shape
    tL = L
    for cand in (1024, 512, 256, 128):
        if L % cand == 0:
            tL = cand
            break
    return pl.pallas_call(
        _degree_routing_kernel,
        out_shape=jax.ShapeDtypeStruct((OC, R, OD, L), jnp.float32),
        grid=(OC, L // tL),
        in_specs=[
            pl.BlockSpec((None, IC, R, OD, tL), lambda o, l: (o, 0, 0, 0, l)),
        ],
        out_specs=pl.BlockSpec((None, R, OD, tL), lambda o, l: (o, 0, 0, l)),
        compiler_params=pltpu.CompilerParams(
            dimension_semantics=("parallel", "parallel")),
    )(pk)


# -----------------------------------------------------------------------------
# Pure-JAX reference for the routing (mirrors the PyTorch code), for validation.
# -----------------------------------------------------------------------------
def routing_ref(predictions):
    # predictions: (b, in_caps, out_caps, out_dim, 4, H, W)
    p = jnp.transpose(predictions, (0, 2, 4, 5, 6, 1, 3))        # (b, oc, 4, H, W, ic, od)
    dot = jnp.matmul(p, jnp.swapaxes(p, -1, -2),
                     precision=lax.Precision.HIGHEST)
    norm_sq = jnp.maximum(jnp.sum(p * p, axis=-1, keepdims=True), 1e-8)
    sim = dot / norm_sq
    score = jax.nn.softmax(jnp.sum(sim, axis=-1, keepdims=True), axis=5)
    score = jnp.transpose(score, (0, 5, 1, 6, 2, 3, 4))          # (b, ic, oc, 1, 4, H, W)
    s_j = jnp.sum(score * predictions, axis=1)                   # (b, oc, od, 4, H, W)
    nrm = jnp.sqrt(jnp.sum(s_j * s_j, axis=3, keepdims=True))
    scale = nrm ** 2 / (1 + nrm ** 2) / (nrm + 1e-8)
    return scale * s_j


# -----------------------------------------------------------------------------
# ConvCapsule forward.
# -----------------------------------------------------------------------------
def conv_capsule_forward(in_capsules, w, b, gamma, beta, *,
                         in_caps, in_dim, out_caps, out_dim,
                         kernel_size, stride, padding, use_pallas=True):
    B = in_capsules.shape[0]
    H, W = in_capsules.shape[-2:]
    k, st, p = kernel_size, stride, padding
    Cin = in_dim * 4
    Cout = out_caps * out_dim
    CoutG = Cout * 4
    G = B * in_caps
    Ho = (H + 2 * p - k) // st + 1
    Wo = (W + 2 * p - k) // st + 1

    x = in_capsules.reshape(G, Cin, H, W)
    tw = expand_p4_weight(w)                                     # (CoutG, Cin, k, k)
    brep = jnp.repeat(b, 4)                                      # GrouPy bias per (channel, rot)

    if not use_pallas:
        # Reference path: same forward, same bf16 conv operands / f32 accumulation.
        y = lax.conv_general_dilated(
            x.astype(jnp.bfloat16), tw.astype(jnp.bfloat16),
            window_strides=(st, st), padding=[(p, p), (p, p)],
            dimension_numbers=("NCHW", "OIHW", "NCHW"),
            preferred_element_type=jnp.float32)
        y = y + brep[None, :, None, None]
        y = y.reshape(G, Cout, 4, Ho, Wo)
        # BatchNorm3d in training mode (batch statistics, affine).
        mean = jnp.mean(y, axis=(0, 2, 3, 4), keepdims=True)
        var = jnp.mean((y - mean) ** 2, axis=(0, 2, 3, 4), keepdims=True)
        y = gamma.reshape(1, -1, 1, 1, 1) * (y - mean) / jnp.sqrt(var + 1e-5) \
            + beta.reshape(1, -1, 1, 1, 1)
        preds = y.reshape(B, in_caps, out_caps, out_dim, 4, Ho, Wo)
        v = routing_ref(preds)                                   # (b, oc, od, 4, H, W)
        if out_caps == 1:
            v = v.reshape(B, out_dim, 4, Ho, Wo)
        return v

    # ---------------- Pallas path ----------------
    Hp = H + 2 * p
    Wp = W + 2 * p
    Ho1 = H + 2 * p - k + 1          # stride-1 output rows computed by the kernel
    Wo1 = W + 2 * p - k + 1
    Msp = Ho1 * Wp
    Npad = ((CoutG + 127) // 128) * 128

    # channels-last, spatially padded (+1 extra zero row for the flat-offset trick)
    xcl = jnp.transpose(x, (0, 2, 3, 1))                         # (G, H, W, Cin)
    xcl = jnp.pad(xcl, ((0, 0), (p, p + 1), (p, p), (0, 0)))     # (G, Hp+1, Wp, Cin)
    xflat = xcl.reshape(G, (Hp + 1) * Wp, Cin)                   # f32, cast in-kernel

    # tap-major weight matrix, column order col = (oc*out_dim + od)*4 + s, lane-padded
    wk = jnp.transpose(tw, (2, 3, 1, 0)).reshape(k * k, Cin, CoutG)
    wk = jnp.pad(wk, ((0, 0), (0, 0), (0, Npad - CoutG))).astype(jnp.bfloat16)
    bcol = jnp.pad(brep, (0, Npad - CoutG)).reshape(1, Npad).astype(jnp.float32)

    y, stats = pl.pallas_call(
        functools.partial(_p4conv_gemm_kernel, k=k, wp=Wp, wo_valid=Wo1),
        out_shape=(jax.ShapeDtypeStruct((G, Msp, Npad), jnp.float32),
                   jax.ShapeDtypeStruct((G, 2, Npad), jnp.float32)),
        grid=(G,),
        in_specs=[
            pl.BlockSpec((None, (Hp + 1) * Wp, Cin), lambda g: (g, 0, 0)),
            pl.BlockSpec((k * k, Cin, Npad), lambda g: (0, 0, 0)),
            pl.BlockSpec((1, Npad), lambda g: (0, 0)),
        ],
        out_specs=(
            pl.BlockSpec((None, Msp, Npad), lambda g: (g, 0, 0)),
            pl.BlockSpec((None, 2, Npad), lambda g: (g, 0, 0)),
        ),
        compiler_params=pltpu.CompilerParams(dimension_semantics=("parallel",)),
    )(xflat, wk, bcol)

    # crop to the valid (stride-sampled) output positions and real columns
    yv = y.reshape(G, Ho1, Wp, Npad)[:, ::st, ::st, :][:, :Ho, :Wo, :CoutG]

    # BatchNorm3d (training-mode batch statistics) per channel c = oc*out_dim + od.
    cnt = G * 4 * Ho * Wo
    if st == 1:
        ch_sum = jnp.sum(stats[:, 0, :CoutG], axis=0).reshape(Cout, 4).sum(axis=1)
        ch_sq = jnp.sum(stats[:, 1, :CoutG], axis=0).reshape(Cout, 4).sum(axis=1)
    else:
        # TODO(synk): in-kernel BN-stat fusion only covers stride == 1; glue fallback.
        t = yv.reshape(G, Ho, Wo, Cout, 4)
        ch_sum = jnp.sum(t, axis=(0, 1, 2, 4))
        ch_sq = jnp.sum(t * t, axis=(0, 1, 2, 4))
    mean_c = ch_sum / cnt
    var_c = jnp.maximum(ch_sq / cnt - mean_c ** 2, 0.0)
    scale_c = gamma / jnp.sqrt(var_c + 1e-5)
    shift_c = beta - mean_c * scale_c
    scale_col = jnp.repeat(scale_c, 4)
    shift_col = jnp.repeat(shift_c, 4)
    # TODO(synk): BN running statistics are not tracked (training-mode forward only).

    # BN affine fused (by XLA) with the single transpose into the routing layout:
    #   pk[oc, ic, s, od, b*Ho*Wo + spatial]
    yv = yv * scale_col + shift_col
    yv = yv.reshape(B, in_caps, Ho, Wo, out_caps, out_dim, 4)
    pk = yv.transpose(4, 1, 6, 5, 0, 2, 3).reshape(
        out_caps, in_caps, 4, out_dim, B * Ho * Wo)

    v = pallas_degree_routing(pk)                                # (oc, 4, od, B*Ho*Wo)
    v = v.reshape(out_caps, 4, out_dim, B, Ho, Wo).transpose(3, 0, 2, 1, 4, 5)

    # torch's .squeeze(dim=1): only removes the dim when out_caps == 1
    if out_caps == 1:
        v = v.reshape(B, out_dim, 4, Ho, Wo)
    return v


if __name__ == "__main__":
    # Small, module-consistent shapes.
    batch, in_caps, in_dim = 2, 2, 4
    out_caps, out_dim = 3, 4
    kernel_size, stride, padding = 3, 1, 1
    H = W = 8

    key = jax.random.PRNGKey(0)
    k_x, k_w, k_b = jax.random.split(key, 3)
    in_capsules = jax.random.normal(k_x, (batch, in_caps, in_dim, 4, H, W), jnp.float32)
    conv_w = 0.1 * jax.random.normal(
        k_w, (out_caps * out_dim, in_dim, 4, kernel_size, kernel_size), jnp.float32)
    conv_b = 0.1 * jax.random.normal(k_b, (out_caps * out_dim,), jnp.float32)
    bn_gamma = jnp.ones((out_caps * out_dim,), jnp.float32)   # PyTorch BatchNorm3d default init
    bn_beta = jnp.zeros((out_caps * out_dim,), jnp.float32)

    fwd = functools.partial(
        conv_capsule_forward,
        in_caps=in_caps, in_dim=in_dim, out_caps=out_caps, out_dim=out_dim,
        kernel_size=kernel_size, stride=stride, padding=padding)
    run_pallas = jax.jit(functools.partial(fwd, use_pallas=True))
    run_ref = jax.jit(functools.partial(fwd, use_pallas=False))

    out = jax.block_until_ready(
        run_pallas(in_capsules, conv_w, conv_b, bn_gamma, bn_beta))
    ref = jax.block_until_ready(
        run_ref(in_capsules, conv_w, conv_b, bn_gamma, bn_beta))

    assert out.shape == (batch, out_caps, out_dim, 4, H, W), out.shape
    max_err = float(jnp.max(jnp.abs(out - ref)))
    assert jnp.allclose(out, ref, rtol=2e-2, atol=2e-2), max_err

    print("KERNEL_OK")
</pallas_src>

<mosaic_0001>
module attributes {stable_mosaic.version = 11 : i64} {
  func.func @_p4conv_gemm_kernel(%arg0: i32, %arg1: memref<1x110x16xf32, #tpu.memory_space<vmem>>, %arg2: memref<9x16x128xbf16, #tpu.memory_space<vmem>>, %arg3: memref<1x128xf32, #tpu.memory_space<vmem>>, %arg4: memref<1x80x128xf32, #tpu.memory_space<vmem>>, %arg5: memref<1x2x128xf32, #tpu.memory_space<vmem>>) attributes {dimension_semantics = [#tpu.dimension_semantics<parallel>], iteration_bounds = array<i64: 4>, scalar_prefetch = 0 : i64, scratch_operands = 0 : i64, tpu.core_type = #tpu.core_type<tc>, window_params = [{transform_indices = @transform_0, window_bounds = array<i64: 1, 110, 16>}, {pipeline_mode = #tpu.pipeline_mode<synchronous>, transform_indices = @transform_1, window_bounds = array<i64: 9, 16, 128>}, {pipeline_mode = #tpu.pipeline_mode<synchronous>, transform_indices = @transform_2, window_bounds = array<i64: 1, 128>}, {transform_indices = @transform_3, window_bounds = array<i64: 1, 80, 128>}, {transform_indices = @transform_4, window_bounds = array<i64: 1, 2, 128>}]} {
    %cst = arith.constant 0.000000e+00 : f32
    %0 = vector.broadcast %cst : f32 to vector<80x128xf32>
    %c0 = arith.constant 0 : index
    %c0_0 = arith.constant 0 : index
    %c0_1 = arith.constant 0 : index
    %1 = vector.load %arg1[%c0, %c0_0, %c0_1] : memref<1x110x16xf32, #tpu.memory_space<vmem>>, vector<1x80x16xf32>
    %2 = vector.shape_cast %1 : vector<1x80x16xf32> to vector<80x16xf32>
    %3 = arith.truncf %2 : vector<80x16xf32> to vector<80x16xbf16>
    %c0_2 = arith.constant 0 : index
    %c0_3 = arith.constant 0 : index
    %c0_4 = arith.constant 0 : index
    %4 = vector.load %arg2[%c0_2, %c0_3, %c0_4] : memref<9x16x128xbf16, #tpu.memory_space<vmem>>, vector<1x16x128xbf16>
    %5 = vector.shape_cast %4 : vector<1x16x128xbf16> to vector<16x128xbf16>
    %cst_5 = arith.constant dense<0.000000e+00> : vector<80x128xf32>
    %6 = tpu.matmul %3, %5, %cst_5 {dimension_numbers = #tpu.dot_dimension_numbers<[1], [0], [0], [1], [0, 0, 1, 1], [], []>} : vector<80x16xbf16>, vector<16x128xbf16>, vector<80x128xf32> -> vector<80x128xf32>
    %7 = arith.addf %0, %6 : vector<80x128xf32>
    %c0_6 = arith.constant 0 : index
    %c1 = arith.constant 1 : index
    %c0_7 = arith.constant 0 : index
    %8 = vector.load %arg1[%c0_6, %c1, %c0_7] : memref<1x110x16xf32, #tpu.memory_space<vmem>>, vector<1x80x16xf32>
    %9 = vector.shape_cast %8 : vector<1x80x16xf32> to vector<80x16xf32>
    %10 = arith.truncf %9 : vector<80x16xf32> to vector<80x16xbf16>
    %c1_8 = arith.constant 1 : index
    %c0_9 = arith.constant 0 : index
    %c0_10 = arith.constant 0 : index
    %11 = vector.load %arg2[%c1_8, %c0_9, %c0_10] : memref<9x16x128xbf16, #tpu.memory_space<vmem>>, vector<1x16x128xbf16>
    %12 = vector.shape_cast %11 : vector<1x16x128xbf16> to vector<16x128xbf16>
    %cst_11 = arith.constant dense<0.000000e+00> : vector<80x128xf32>
    %13 = tpu.matmul %10, %12, %cst_11 {dimension_numbers = #tpu.dot_dimension_numbers<[1], [0], [0], [1], [0, 0, 1, 1], [], []>} : vector<80x16xbf16>, vector<16x128xbf16>, vector<80x128xf32> -> vector<80x128xf32>
    %14 = arith.addf %7, %13 : vector<80x128xf32>
    %c0_12 = arith.constant 0 : index
    %c2 = arith.constant 2 : index
    %c0_13 = arith.constant 0 : index
    %15 = vector.load %arg1[%c0_12, %c2, %c0_13] : memref<1x110x16xf32, #tpu.memory_space<vmem>>, vector<1x80x16xf32>
    %16 = vector.shape_cast %15 : vector<1x80x16xf32> to vector<80x16xf32>
    %17 = arith.truncf %16 : vector<80x16xf32> to vector<80x16xbf16>
    %c2_14 = arith.constant 2 : index
    %c0_15 = arith.constant 0 : index
    %c0_16 = arith.constant 0 : index
    %18 = vector.load %arg2[%c2_14, %c0_15, %c0_16] : memref<9x16x128xbf16, #tpu.memory_space<vmem>>, vector<1x16x128xbf16>
    %19 = vector.shape_cast %18 : vector<1x16x128xbf16> to vector<16x128xbf16>
    %cst_17 = arith.constant dense<0.000000e+00> : vector<80x128xf32>
    %20 = tpu.matmul %17, %19, %cst_17 {dimension_numbers = #tpu.dot_dimension_numbers<[1], [0], [0], [1], [0, 0, 1, 1], [], []>} : vector<80x16xbf16>, vector<16x128xbf16>, vector<80x128xf32> -> vector<80x128xf32>
    %21 = arith.addf %14, %20 : vector<80x128xf32>
    %c0_18 = arith.constant 0 : index
    %c10 = arith.constant 10 : index
    %c0_19 = arith.constant 0 : index
    %22 = vector.load %arg1[%c0_18, %c10, %c0_19] : memref<1x110x16xf32, #tpu.memory_space<vmem>>, vector<1x80x16xf32>
    %23 = vector.shape_cast %22 : vector<1x80x16xf32> to vector<80x16xf32>
    %24 = arith.truncf %23 : vector<80x16xf32> to vector<80x16xbf16>
    %c3 = arith.constant 3 : index
    %c0_20 = arith.constant 0 : index
    %c0_21 = arith.constant 0 : index
    %25 = vector.load %arg2[%c3, %c0_20, %c0_21] : memref<9x16x128xbf16, #tpu.memory_space<vmem>>, vector<1x16x128xbf16>
    %26 = vector.shape_cast %25 : vector<1x16x128xbf16> to vector<16x128xbf16>
    %cst_22 = arith.constant dense<0.000000e+00> : vector<80x128xf32>
    %27 = tpu.matmul %24, %26, %cst_22 {dimension_numbers = #tpu.dot_dimension_numbers<[1], [0], [0], [1], [0, 0, 1, 1], [], []>} : vector<80x16xbf16>, vector<16x128xbf16>, vector<80x128xf32> -> vector<80x128xf32>
    %28 = arith.addf %21, %27 : vector<80x128xf32>
    %c0_23 = arith.constant 0 : index
    %c11 = arith.constant 11 : index
    %c0_24 = arith.constant 0 : index
    %29 = vector.load %arg1[%c0_23, %c11, %c0_24] : memref<1x110x16xf32, #tpu.memory_space<vmem>>, vector<1x80x16xf32>
    %30 = vector.shape_cast %29 : vector<1x80x16xf32> to vector<80x16xf32>
    %31 = arith.truncf %30 : vector<80x16xf32> to vector<80x16xbf16>
    %c4 = arith.constant 4 : index
    %c0_25 = arith.constant 0 : index
    %c0_26 = arith.constant 0 : index
    %32 = vector.load %arg2[%c4, %c0_25, %c0_26] : memref<9x16x128xbf16, #tpu.memory_space<vmem>>, vector<1x16x128xbf16>
    %33 = vector.shape_cast %32 : vector<1x16x128xbf16> to vector<16x128xbf16>
    %cst_27 = arith.constant dense<0.000000e+00> : vector<80x128xf32>
    %34 = tpu.matmul %31, %33, %cst_27 {dimension_numbers = #tpu.dot_dimension_numbers<[1], [0], [0], [1], [0, 0, 1, 1], [], []>} : vector<80x16xbf16>, vector<16x128xbf16>, vector<80x128xf32> -> vector<80x128xf32>
    %35 = arith.addf %28, %34 : vector<80x128xf32>
    %c0_28 = arith.constant 0 : index
    %c12 = arith.constant 12 : index
    %c0_29 = arith.constant 0 : index
    %36 = vector.load %arg1[%c0_28, %c12, %c0_29] : memref<1x110x16xf32, #tpu.memory_space<vmem>>, vector<1x80x16xf32>
    %37 = vector.shape_cast %36 : vector<1x80x16xf32> to vector<80x16xf32>
    %38 = arith.truncf %37 : vector<80x16xf32> to vector<80x16xbf16>
    %c5 = arith.constant 5 : index
    %c0_30 = arith.constant 0 : index
    %c0_31 = arith.constant 0 : index
    %39 = vector.load %arg2[%c5, %c0_30, %c0_31] : memref<9x16x128xbf16, #tpu.memory_space<vmem>>, vector<1x16x128xbf16>
    %40 = vector.shape_cast %39 : vector<1x16x128xbf16> to vector<16x128xbf16>
    %cst_32 = arith.constant dense<0.000000e+00> : vector<80x128xf32>
    %41 = tpu.matmul %38, %40, %cst_32 {dimension_numbers = #tpu.dot_dimension_numbers<[1], [0], [0], [1], [0, 0, 1, 1], [], []>} : vector<80x16xbf16>, vector<16x128xbf16>, vector<80x128xf32> -> vector<80x128xf32>
    %42 = arith.addf %35, %41 : vector<80x128xf32>
    %c0_33 = arith.constant 0 : index
    %c20 = arith.constant 20 : index
    %c0_34 = arith.constant 0 : index
    %43 = vector.load %arg1[%c0_33, %c20, %c0_34] : memref<1x110x16xf32, #tpu.memory_space<vmem>>, vector<1x80x16xf32>
    %44 = vector.shape_cast %43 : vector<1x80x16xf32> to vector<80x16xf32>
    %45 = arith.truncf %44 : vector<80x16xf32> to vector<80x16xbf16>
    %c6 = arith.constant 6 : index
    %c0_35 = arith.constant 0 : index
    %c0_36 = arith.constant 0 : index
    %46 = vector.load %arg2[%c6, %c0_35, %c0_36] : memref<9x16x128xbf16, #tpu.memory_space<vmem>>, vector<1x16x128xbf16>
    %47 = vector.shape_cast %46 : vector<1x16x128xbf16> to vector<16x128xbf16>
    %cst_37 = arith.constant dense<0.000000e+00> : vector<80x128xf32>
    %48 = tpu.matmul %45, %47, %cst_37 {dimension_numbers = #tpu.dot_dimension_numbers<[1], [0], [0], [1], [0, 0, 1, 1], [], []>} : vector<80x16xbf16>, vector<16x128xbf16>, vector<80x128xf32> -> vector<80x128xf32>
    %49 = arith.addf %42, %48 : vector<80x128xf32>
    %c0_38 = arith.constant 0 : index
    %c21 = arith.constant 21 : index
    %c0_39 = arith.constant 0 : index
    %50 = vector.load %arg1[%c0_38, %c21, %c0_39] : memref<1x110x16xf32, #tpu.memory_space<vmem>>, vector<1x80x16xf32>
    %51 = vector.shape_cast %50 : vector<1x80x16xf32> to vector<80x16xf32>
    %52 = arith.truncf %51 : vector<80x16xf32> to vector<80x16xbf16>
    %c7 = arith.constant 7 : index
    %c0_40 = arith.constant 0 : index
    %c0_41 = arith.constant 0 : index
    %53 = vector.load %arg2[%c7, %c0_40, %c0_41] : memref<9x16x128xbf16, #tpu.memory_space<vmem>>, vector<1x16x128xbf16>
    %54 = vector.shape_cast %53 : vector<1x16x128xbf16> to vector<16x128xbf16>
    %cst_42 = arith.constant dense<0.000000e+00> : vector<80x128xf32>
    %55 = tpu.matmul %52, %54, %cst_42 {dimension_numbers = #tpu.dot_dimension_numbers<[1], [0], [0], [1], [0, 0, 1, 1], [], []>} : vector<80x16xbf16>, vector<16x128xbf16>, vector<80x128xf32> -> vector<80x128xf32>
    %56 = arith.addf %49, %55 : vector<80x128xf32>
    %c0_43 = arith.constant 0 : index
    %c22 = arith.constant 22 : index
    %c0_44 = arith.constant 0 : index
    %57 = vector.load %arg1[%c0_43, %c22, %c0_44] : memref<1x110x16xf32, #tpu.memory_space<vmem>>, vector<1x80x16xf32>
    %58 = vector.shape_cast %57 : vector<1x80x16xf32> to vector<80x16xf32>
    %59 = arith.truncf %58 : vector<80x16xf32> to vector<80x16xbf16>
    %c8 = arith.constant 8 : index
    %c0_45 = arith.constant 0 : index
    %c0_46 = arith.constant 0 : index
    %60 = vector.load %arg2[%c8, %c0_45, %c0_46] : memref<9x16x128xbf16, #tpu.memory_space<vmem>>, vector<1x16x128xbf16>
    %61 = vector.shape_cast %60 : vector<1x16x128xbf16> to vector<16x128xbf16>
    %cst_47 = arith.constant dense<0.000000e+00> : vector<80x128xf32>
    %62 = tpu.matmul %59, %61, %cst_47 {dimension_numbers = #tpu.dot_dimension_numbers<[1], [0], [0], [1], [0, 0, 1, 1], [], []>} : vector<80x16xbf16>, vector<16x128xbf16>, vector<80x128xf32> -> vector<80x128xf32>
    %63 = arith.addf %56, %62 : vector<80x128xf32>
    %c0_48 = arith.constant 0 : index
    %c0_49 = arith.constant 0 : index
    %64 = vector.load %arg3[%c0_48, %c0_49] : memref<1x128xf32, #tpu.memory_space<vmem>>, vector<1x128xf32>
    %65 = vector.broadcast %64 : vector<1x128xf32> to vector<80x128xf32>
    %66 = arith.addf %63, %65 : vector<80x128xf32>
    %c0_50 = arith.constant 0 : index
    %c0_51 = arith.constant 0 : index
    %c0_52 = arith.constant 0 : index
    %67 = vector.load %arg4[%c0_50, %c0_51, %c0_52] : memref<1x80x128xf32, #tpu.memory_space<vmem>>, vector<1x80x128xf32>
    %68 = vector.shape_cast %67 : vector<1x80x128xf32> to vector<80x128xf32>
    %69 = vector.shape_cast %66 : vector<80x128xf32> to vector<1x80x128xf32>
    tpu.vector_store %arg4[%c0_50, %c0_51, %c0_52], %69 {strides = array<i32>} : memref<1x80x128xf32, #tpu.memory_space<vmem>>, vector<1x80x128xf32>,
    %70 = tpu.iota {dimensions = array<i32: 0>} : vector<80x1xi32>
    %c10_i32 = arith.constant 10 : i32
    %c0_i32 = arith.constant 0 : i32
    %71 = arith.cmpi eq, %c10_i32, %c0_i32 : i32
    %c1_i32 = arith.constant 1 : i32
    %72 = arith.select %71, %c1_i32, %c10_i32 : i32
    %73 = vector.broadcast %72 : i32 to vector<80x1xi32>
    %74 = arith.remsi %70, %73 : vector<80x1xi32>
    %c0_i32_53 = arith.constant 0 : i32
    %75 = vector.broadcast %c0_i32_53 : i32 to vector<80x1xi32>
    %76 = arith.cmpi ne, %74, %75 : vector<80x1xi32>
    %c0_i32_54 = arith.constant 0 : i32
    %77 = vector.broadcast %c0_i32_54 : i32 to vector<80x1xi32>
    %78 = arith.cmpi slt, %74, %77 : vector<80x1xi32>
    %c0_i32_55 = arith.constant 0 : i32
    %79 = arith.cmpi slt, %72, %c0_i32_55 : i32
    %80 = vector.broadcast %79 : i1 to vector<80x1xi1>
    %81 = vector.broadcast %80 : vector<80x1xi1> to vector<80x1xi1>
    %82 = arith.xori %78, %81 : vector<80x1xi1>
    %83 = arith.andi %82, %76 : vector<80x1xi1>
    %84 = vector.broadcast %72 : i32 to vector<80x1xi32>
    %85 = arith.addi %74, %84 : vector<80x1xi32>
    %86 = arith.select %83, %85, %74 : vector<80x1xi1>, vector<80x1xi32>
    %c8_i32 = arith.constant 8 : i32
    %87 = vector.broadcast %c8_i32 : i32 to vector<80x1xi32>
    %88 = arith.cmpi slt, %86, %87 : vector<80x1xi32>
    %cst_56 = arith.constant 0.000000e+00 : f32
    %89 = vector.shape_cast %88 : vector<80x1xi1> to vector<80x1xi1>
    %90 = vector.broadcast %89 : vector<80x1xi1> to vector<80x128xi1>
    %91 = vector.broadcast %cst_56 : f32 to vector<80x128xf32>
    %92 = arith.select %90, %66, %91 : vector<80x128xi1>, vector<80x128xf32>
    %cst_57 = arith.constant dense<0.000000e+00> : vector<128xf32>
    %93 = vector.multi_reduction <add>, %92, %cst_57 [0] : vector<80x128xf32> to vector<128xf32>
    %94 = vector.shape_cast %93 : vector<128xf32> to vector<1x128xf32>
    %c0_58 = arith.constant 0 : index
    %c0_59 = arith.constant 0 : index
    %c0_60 = arith.constant 0 : index
    %95 = vector.load %arg5[%c0_58, %c0_59, %c0_60] : memref<1x2x128xf32, #tpu.memory_space<vmem>>, vector<1x1x128xf32>
    %96 = vector.shape_cast %95 : vector<1x1x128xf32> to vector<1x128xf32>
    %97 = vector.shape_cast %94 : vector<1x128xf32> to vector<1x1x128xf32>
    tpu.vector_store %arg5[%c0_58, %c0_59, %c0_60], %97 {strides = array<i32>} : memref<1x2x128xf32, #tpu.memory_space<vmem>>, vector<1x1x128xf32>,
    %98 = arith.mulf %92, %92 : vector<80x128xf32>
    %cst_61 = arith.constant dense<0.000000e+00> : vector<128xf32>
    %99 = vector.multi_reduction <add>, %98, %cst_61 [0] : vector<80x128xf32> to vector<128xf32>
    %100 = vector.shape_cast %99 : vector<128xf32> to vector<1x128xf32>
    %c0_62 = arith.constant 0 : index
    %c1_63 = arith.constant 1 : index
    %c0_64 = arith.constant 0 : index
    %101 = vector.load %arg5[%c0_62, %c1_63, %c0_64] : memref<1x2x128xf32, #tpu.memory_space<vmem>>, vector<1x1x128xf32>
    %102 = vector.shape_cast %101 : vector<1x1x128xf32> to vector<1x128xf32>
    %103 = vector.shape_cast %100 : vector<1x128xf32> to vector<1x1x128xf32>
    tpu.vector_store %arg5[%c0_62, %c1_63, %c0_64], %103 {strides = array<i32>} : memref<1x2x128xf32, #tpu.memory_space<vmem>>, vector<1x1x128xf32>,
    return
  }
  func.func @transform_0(%arg0: i32) -> (i32, i32, i32) {
    %c0_i32 = arith.constant 0 : i32
    %c0_i32_0 = arith.constant 0 : i32
    %c0_i32_1 = arith.constant 0 : i32
    return %arg0, %c0_i32, %c0_i32_0 : i32, i32, i32
  }
  func.func @transform_1(%arg0: i32) -> (i32, i32, i32) {
    %c0_i32 = arith.constant 0 : i32
    %c0_i32_0 = arith.constant 0 : i32
    %c0_i32_1 = arith.constant 0 : i32
    %c0_i32_2 = arith.constant 0 : i32
    return %c0_i32, %c0_i32_0, %c0_i32_1 : i32, i32, i32
  }
  func.func @transform_2(%arg0: i32) -> (i32, i32) {
    %c0_i32 = arith.constant 0 : i32
    %c0_i32_0 = arith.constant 0 : i32
    %c0_i32_1 = arith.constant 0 : i32
    return %c0_i32, %c0_i32_0 : i32, i32
  }
  func.func @transform_3(%arg0: i32) -> (i32, i32, i32) {
    %c0_i32 = arith.constant 0 : i32
    %c0_i32_0 = arith.constant 0 : i32
    %c0_i32_1 = arith.constant 0 : i32
    return %arg0, %c0_i32, %c0_i32_0 : i32, i32, i32
  }
  func.func @transform_4(%arg0: i32) -> (i32, i32, i32) {
    %c0_i32 = arith.constant 0 : i32
    %c0_i32_0 = arith.constant 0 : i32
    %c0_i32_1 = arith.constant 0 : i32
    return %arg0, %c0_i32, %c0_i32_0 : i32, i32, i32
  }
}

module attributes {stable_mosaic.version = 11 : i64} {
  func.func @_degree_routing_kernel(%arg0: i32, %arg1: i32, %arg2: memref<1x2x4x4x128xf32, #tpu.memory_space<vmem>>, %arg3: memref<1x4x4x128xf32, #tpu.memory_space<vmem>>) attributes {dimension_semantics = [#tpu.dimension_semantics<parallel>, #tpu.dimension_semantics<parallel>], iteration_bounds = array<i64: 3, 1>, scalar_prefetch = 0 : i64, scratch_operands = 0 : i64, tpu.core_type = #tpu.core_type<tc>, window_params = [{transform_indices = @transform_0, window_bounds = array<i64: 1, 2, 4, 4, 128>}, {transform_indices = @transform_1, window_bounds = array<i64: 1, 4, 4, 128>}]} {
    %c0 = arith.constant 0 : index
    %c0_0 = arith.constant 0 : index
    %c0_1 = arith.constant 0 : index
    %c0_2 = arith.constant 0 : index
    %c0_3 = arith.constant 0 : index
    %0 = vector.load %arg2[%c0, %c0_0, %c0_1, %c0_2, %c0_3] : memref<1x2x4x4x128xf32, #tpu.memory_space<vmem>>, vector<1x2x4x4x128xf32>
    %1 = vector.shape_cast %0 : vector<1x2x4x4x128xf32> to vector<2x4x4x128xf32>
    %cst = arith.constant dense<0.000000e+00> : vector<4x4x128xf32>
    %2 = vector.multi_reduction <add>, %1, %cst [0] : vector<2x4x4x128xf32> to vector<4x4x128xf32>
    %3 = vector.shape_cast %2 : vector<4x4x128xf32> to vector<1x4x4x128xf32>
    %4 = vector.broadcast %3 : vector<1x4x4x128xf32> to vector<2x4x4x128xf32>
    %5 = arith.mulf %1, %4 : vector<2x4x4x128xf32>
    %cst_4 = arith.constant dense<0.000000e+00> : vector<2x4x128xf32>
    %6 = vector.multi_reduction <add>, %5, %cst_4 [2] : vector<2x4x4x128xf32> to vector<2x4x128xf32>
    %7 = vector.shape_cast %6 : vector<2x4x128xf32> to vector<2x4x1x128xf32>
    %8 = arith.mulf %1, %1 : vector<2x4x4x128xf32>
    %cst_5 = arith.constant dense<0.000000e+00> : vector<2x4x128xf32>
    %9 = vector.multi_reduction <add>, %8, %cst_5 [2] : vector<2x4x4x128xf32> to vector<2x4x128xf32>
    %10 = vector.shape_cast %9 : vector<2x4x128xf32> to vector<2x4x1x128xf32>
    %cst_6 = arith.constant 9.99999993E-9 : f32
    %11 = vector.broadcast %cst_6 : f32 to vector<2x4x1x128xf32>
    %12 = arith.maximumf %10, %11 : vector<2x4x1x128xf32>
    %13 = arith.divf %7, %12 : vector<2x4x1x128xf32>
    %cst_7 = arith.constant dense<0xFF800000> : vector<4x1x128xf32>
    %14 = vector.multi_reduction <maximumf>, %13, %cst_7 [0] : vector<2x4x1x128xf32> to vector<4x1x128xf32>
    %15 = vector.shape_cast %14 : vector<4x1x128xf32> to vector<1x4x1x128xf32>
    %16 = vector.broadcast %15 : vector<1x4x1x128xf32> to vector<2x4x1x128xf32>
    %17 = arith.subf %13, %16 : vector<2x4x1x128xf32>
    %18 = math.exp %17 : vector<2x4x1x128xf32>
    %cst_8 = arith.constant dense<0.000000e+00> : vector<4x1x128xf32>
    %19 = vector.multi_reduction <add>, %18, %cst_8 [0] : vector<2x4x1x128xf32> to vector<4x1x128xf32>
    %20 = vector.shape_cast %19 : vector<4x1x128xf32> to vector<1x4x1x128xf32>
    %21 = tpu.reciprocal %20 {approx = true} : vector<1x4x1x128xf32> -> vector<1x4x1x128xf32>
    %22 = vector.broadcast %21 : vector<1x4x1x128xf32> to vector<2x4x1x128xf32>
    %23 = arith.mulf %18, %22 : vector<2x4x1x128xf32>
    %24 = vector.broadcast %23 : vector<2x4x1x128xf32> to vector<2x4x4x128xf32>
    %25 = arith.mulf %24, %1 : vector<2x4x4x128xf32>
    %cst_9 = arith.constant dense<0.000000e+00> : vector<4x4x128xf32>
    %26 = vector.multi_reduction <add>, %25, %cst_9 [0] : vector<2x4x4x128xf32> to vector<4x4x128xf32>
    %27 = arith.mulf %26, %26 : vector<4x4x128xf32>
    %cst_10 = arith.constant dense<0.000000e+00> : vector<4x128xf32>
    %28 = vector.multi_reduction <add>, %27, %cst_10 [0] : vector<4x4x128xf32> to vector<4x128xf32>
    %29 = vector.shape_cast %28 : vector<4x128xf32> to vector<1x4x128xf32>
    %30 = math.sqrt %29 : vector<1x4x128xf32>
    %cst_11 = arith.constant 1.000000e+00 : f32
    %31 = vector.broadcast %cst_11 : f32 to vector<1x4x128xf32>
    %32 = arith.addf %31, %29 : vector<1x4x128xf32>
    %cst_12 = arith.constant 9.99999993E-9 : f32
    %33 = vector.broadcast %cst_12 : f32 to vector<1x4x128xf32>
    %34 = arith.addf %30, %33 : vector<1x4x128xf32>
    %35 = arith.mulf %32, %34 : vector<1x4x128xf32>
    %36 = tpu.reciprocal %35 {approx = true} : vector<1x4x128xf32> -> vector<1x4x128xf32>
    %37 = arith.mulf %29, %36 : vector<1x4x128xf32>
    %38 = vector.broadcast %37 : vector<1x4x128xf32> to vector<4x4x128xf32>
    %39 = arith.mulf %38, %26 : vector<4x4x128xf32>
    %c0_13 = arith.constant 0 : index
    %c0_14 = arith.constant 0 : index
    %c0_15 = arith.constant 0 : index
    %c0_16 = arith.constant 0 : index
    %40 = vector.load %arg3[%c0_13, %c0_14, %c0_15, %c0_16] : memref<1x4x4x128xf32, #tpu.memory_space<vmem>>, vector<1x4x4x128xf32>
    %41 = vector.shape_cast %40 : vector<1x4x4x128xf32> to vector<4x4x128xf32>
    %42 = vector.shape_cast %39 : vector<4x4x128xf32> to vector<1x4x4x128xf32>
    tpu.vector_store %arg3[%c0_13, %c0_14, %c0_15, %c0_16], %42 {strides = array<i32>} : memref<1x4x4x128xf32, #tpu.memory_space<vmem>>, vector<1x4x4x128xf32>,
    return
  }
  func.func @transform_0(%arg0: i32, %arg1: i32) -> (i32, i32, i32, i32, i32) {
    %c0_i32 = arith.constant 0 : i32
    %c0_i32_0 = arith.constant 0 : i32
    %c0_i32_1 = arith.constant 0 : i32
    %c0_i32_2 = arith.constant 0 : i32
    return %arg0, %c0_i32, %c0_i32_0, %c0_i32_1, %arg1 : i32, i32, i32, i32, i32
  }
  func.func @transform_1(%arg0: i32, %arg1: i32) -> (i32, i32, i32, i32) {
    %c0_i32 = arith.constant 0 : i32
    %c0_i32_0 = arith.constant 0 : i32
    %c0_i32_1 = arith.constant 0 : i32
    return %arg0, %c0_i32, %c0_i32_0, %arg1 : i32, i32, i32, i32
  }
}

</mosaic_0001>

<bundles_post_ra>
// kernel: conv_capsule_forward.2
= control target key start
LH: loop header
LB: loop body
LE: loop exit
PB: predicated region body
PF: predicated region fallthrough
CT: control target
= control target key end

     0   :  { %s2065_s15 = smov 0   ;;  %s2692_s0 = inlined_call_operand.vmem [shape: f32[4,110,16], index: 0, kind: input, shape index: {}]   ;;  %s2693_s1 = inlined_call_operand.vmem [shape: bf16[9,16,128], index: 1, kind: input, shape index: {}]   ;;  %s2694_s2 = inlined_call_operand.vmem [shape: f32[1,128], index: 2, kind: input, shape index: {}]   ;;  %s2695_s3 = inlined_call_operand.vmem [shape: f32[4,80,128], index: 3, kind: output, shape index: {0}]   ;;  %s2696_s4 = inlined_call_operand.vmem [shape: f32[4,2,128], index: 4, kind: output, shape index: {1}]  }
   0x1 LB: > { %s1654_s16 = sadd.s32 4294967295, %s2036_s15   ;;  %p1658_p0 = scmp.ge.s32.totalorder %s2036_s15, 1  ;;  %s2036_s15 = sphi %s2065_s15, %s15_s15  }
   0x2   : > { %p165_p1 = scmp.lt.s32.totalorder %s2036_s15, 5 }
   0x4   : > { %p166_p2 = pnand %p1658_p0, %p165_p1 }
   0x5   : > { %p195_p3 = scmp.lt.s32.totalorder (!%p166_p2), %s1654_s16, 3 }
   0x6   : > { %169 = sbr.rel (%p166_p2) target bundleno = 413 (0x19d), region = 32 }
   0xb   : > { %v2021_v0 = vld [vmem:[%s2693_s1 + $0x8] sm:$0xff]   ;;  %v2038_v1 = vmov 0.0   ;;  %vm2039_vm0 = vmmov 0   ;;  %s2730_s16 = smov (!%p195_p3, %s1654_s16), 3  ;;  %v2022_v2 = vld [vmem:[%s2693_s1 + $0x10] sm:$0xff]   ;;  %vm251_vm1 = vcmask 130048  }
   0xc   : > { %1789 = vmatprep.subr.bf16.mxu0 %v2038_v1  ;;  %1987 = vmatprep.subr.bf16.mxu1 %v2038_v1  ;;  %s1989_s19 = smul.u32 112, %s2730_s16  ;;  %v2023_v8 = vld [vmem:[%s2693_s1] sm:$0xff]   ;;  %v2024_v22 = vld [vmem:[%s2693_s1 + $0x18] sm:$0xff]   ;;  %v2026_v52 = vld [vmem:[%s2693_s1 + $0x28] sm:$0xff]   ;;  %s1661_s21 = sshll.u32 %s2730_s16, 1 }
   0xd   : > { %1790 = vmatpush3.bf16.msra.mxu0 %v2021_v0  ;;  %1988 = vmatpush3.bf16.msra.mxu1 %v2021_v0  ;;  %v2025_v29 = vld [vmem:[%s2693_s1 + $0x20] sm:$0xff]   ;;  %v2027_v57 = vld [vmem:[%s2693_s1 + $0x30] sm:$0xff]   ;;  %s1990_s13 = smul.u32 80, %s2730_s16  ;;  %s208_s24 = scalar_lea.vmem %s2696_s4, %s1661_s21 }
   0xe   : > { %1791 = vmatprep.mubr.msk.bf16.mxu0 %vm2039_vm0, %v2038_v1  ;;  %1803 = vmatprep.mubr.msk.bf16.mxu1 %vm2039_vm0, %v2038_v1  ;;  %s2090_s22 = scalar_lea.vmem %s2692_s0, %s1989_s19 }
   0xf   : > { %1833 = vmatprep.subr.bf16.mxu0 %v2038_v1  ;;  %1811 = vmatprep.subr.bf16.mxu1 %v2038_v1  ;;  %v227_v3 = vld [vmem:[%s2090_s22 + $0x1] sm:$0xff]  ;;  %v228_v4 = vld [vmem:[%s2090_s22 + $0x9] sm:$0xff]  ;;  %v233_v5 = vld [vmem:[%s2090_s22 + $0x31] sm:$0xff]  ;;  %s2488_s20 = scalar_lea.vmem %s2695_s3, %s1990_s13 }
  0x10   : > { %v237_v6 = vpack.c.bf16 %v228_v4, %v227_v3  ;;  %v234_v7 = vld [vmem:[%s2090_s22 + $0x39] sm:$0xff]  ;;  %v229_v10 = vld [vmem:[%s2090_s22 + $0x11] sm:$0xff]  ;;  %v235_v12 = vld [vmem:[%s2090_s22 + $0x41] sm:$0xff] }
  0x11   : > { %v240_v9 = vpack.c.bf16 %v234_v7, %v233_v5  ;;  %v230_v11 = vld [vmem:[%s2090_s22 + $0x19] sm:$0xff]  ;;  %v236_v13 = vld [vmem:[%s2090_s22 + $0x49] sm:$0xff]  ;;  %v231_v16 = vld [vmem:[%s2090_s22 + $0x21] sm:$0xff] }
  0x12   : > { %1792 = vmatmul.mubr.msk.bf16.vlgmr.msra.gmra.mxu0 %vm251_vm1, %v237_v6  ;;  %v238_v14 = vpack.c.bf16 %v230_v11, %v229_v10  ;;  %v241_v15 = vpack.c.bf16 %v236_v13, %v235_v12  ;;  %v232_v17 = vld [vmem:[%s2090_s22 + $0x29] sm:$0xff]  ;;  %v210_v18 = vld [vmem:[%s2090_s22] sm:$0xff]  ;;  %v213_v26 = vld [vmem:[%s2090_s22 + $0x18] sm:$0xff] }
  0x13   : > { %1804 = vmatmul.mubr.msk.bf16.vlgmr.msra.gmra.mxu1 %vm251_vm1, %v240_v9  ;;  %1834 = vmatpush3.bf16.msra.mxu0 %v2022_v2  ;;  %v211_v19 = vld [vmem:[%s2090_s22 + $0x8] sm:$0xff]  ;;  %v239_v20 = vpack.c.bf16 %v232_v17, %v231_v16  ;;  %v212_v25 = vld [vmem:[%s2090_s22 + $0x10] sm:$0xff]  ;;  %v437_v31 = vld [vmem:[%s2090_s22 + $0x1a] sm:$0xff] }
  0x14   : > { %1812 = vmatpush3.bf16.msra.mxu1 %v2023_v8  ;;  %1795 = vmatprep.mubr.msk.bf16.mxu0 %vm2039_vm0, %v2038_v1  ;;  %v220_v21 = vpack.c.bf16 %v211_v19, %v210_v18  ;;  %v434_v23 = vld [vmem:[%s2090_s22 + $0x2] sm:$0xff]  ;;  %v435_v24 = vld [vmem:[%s2090_s22 + $0xa] sm:$0xff]  ;;  %v221_v28 = vpack.c.bf16 %v213_v26, %v212_v25  ;;  %v436_v30 = vld [vmem:[%s2090_s22 + $0x12] sm:$0xff] }
  0x15   : > { %1807 = vmatprep.mubr.msk.bf16.mxu1 %vm2039_vm0, %v2038_v1  ;;  %1855 = vmatprep.subr.bf16.mxu1 %v2038_v1  ;;  %v444_v27 = vpack.c.bf16 %v435_v24, %v434_v23  ;;  %v214_v32 = vld [vmem:[%s2090_s22 + $0x20] sm:$0xff]  ;;  %v215_v33 = vld [vmem:[%s2090_s22 + $0x28] sm:$0xff]  ;;  %v445_v34 = vpack.c.bf16 %v437_v31, %v436_v30  ;;  %v216_v38 = vld [vmem:[%s2090_s22 + $0x30] sm:$0xff]  ;;  %v566_v51 = vpack.c.bf16 %v436_v30, %v435_v24 }
  0x16   : > { %1877 = vmatprep.subr.bf16.mxu0 %v2038_v1  ;;  %v222_v35 = vpack.c.bf16 %v215_v33, %v214_v32  ;;  %v438_v36 = vld [vmem:[%s2090_s22 + $0x22] sm:$0xff]  ;;  %v439_v37 = vld [vmem:[%s2090_s22 + $0x2a] sm:$0xff]  ;;  %v217_v39 = vld [vmem:[%s2090_s22 + $0x38] sm:$0xff] }
  0x17   : > { %v446_v40 = vpack.c.bf16 %v439_v37, %v438_v36  ;;  %v223_v41 = vpack.c.bf16 %v217_v39, %v216_v38  ;;  %v440_v42 = vld [vmem:[%s2090_s22 + $0x32] sm:$0xff]  ;;  %v441_v43 = vld [vmem:[%s2090_s22 + $0x3a] sm:$0xff]  ;;  %v219_v45 = vld [vmem:[%s2090_s22 + $0x48] sm:$0xff]  ;;  %v567_v56 = vpack.c.bf16 %v438_v36, %v437_v31 }
  0x18   : > { %v218_v44 = vld [vmem:[%s2090_s22 + $0x40] sm:$0xff]  ;;  %v447_v46 = vpack.c.bf16 %v441_v43, %v440_v42  ;;  %v443_v49 = vld [vmem:[%s2090_s22 + $0x4a] sm:$0xff]  ;;  %v679_v54 = vld [vmem:[%s2090_s22 + $0x13] sm:$0xff]  ;;  %v568_v61 = vpack.c.bf16 %v440_v42, %v439_v37 }
  0x19   : > { %v224_v47 = vpack.c.bf16 %v219_v45, %v218_v44  ;;  %v442_v48 = vld [vmem:[%s2090_s22 + $0x42] sm:$0xff]  ;;  %v678_v53 = vld [vmem:[%s2090_s22 + $0xb] sm:$0xff]  ;;  %v683_v63 = vld [vmem:[%s2090_s22 + $0x33] sm:$0xff] }
  0x1a   : > { %1796 = vmatmul.mubr.msk.bf16.gmra.mxu0 %vm251_vm1, %v238_v14  ;;  %v448_v50 = vpack.c.bf16 %v443_v49, %v442_v48  ;;  %v688_v55 = vpack.c.bf16 %v679_v54, %v678_v53  ;;  %v680_v58 = vld [vmem:[%s2090_s22 + $0x1b] sm:$0xff]  ;;  %v681_v59 = vld [vmem:[%s2090_s22 + $0x23] sm:$0xff]  ;;  %v682_v62 = vld [vmem:[%s2090_s22 + $0x2b] sm:$0xff]  ;;  %v569_v2 = vpack.c.bf16 %v442_v48, %v441_v43 }
  0x1b   : > { %1808 = vmatmul.mubr.msk.bf16.gmra.mxu1 %vm251_vm1, %v241_v15  ;;  %1799 = vmatprep.mubr.msk.bf16.mxu0 %vm2039_vm0, %v2038_v1  ;;  %v689_v60 = vpack.c.bf16 %v681_v59, %v680_v58  ;;  %v690_v0 = vpack.c.bf16 %v683_v63, %v682_v62  ;;  %v684_v3 = vld [vmem:[%s2090_s22 + $0x3b] sm:$0xff]  ;;  %v685_v4 = vld [vmem:[%s2090_s22 + $0x43] sm:$0xff]  ;;  %v565_v5 = vld [vmem:[%s2090_s22 + $0x52] sm:$0xff] }
  0x1c   : > { %1813 = vmatprep.mubr.msk.bf16.mxu1 %vm2039_vm0, %v2038_v1  ;;  %v691_v6 = vpack.c.bf16 %v685_v4, %v684_v3  ;;  %v570_v7 = vpack.c.bf16 %v565_v5, %v443_v49  ;;  %v686_v8 = vld [vmem:[%s2090_s22 + $0x4b] sm:$0xff]  ;;  %v687_v9 = vld [vmem:[%s2090_s22 + $0x53] sm:$0xff]  ;;  %v802_v15 = vld [vmem:[%s2090_s22 + $0x1c] sm:$0xff] }
  0x1d   : > { %v800_v10 = vld [vmem:[%s2090_s22 + $0xc] sm:$0xff]  ;;  %v801_v11 = vld [vmem:[%s2090_s22 + $0x14] sm:$0xff]  ;;  %v692_v12 = vpack.c.bf16 %v687_v9, %v686_v8  ;;  %v803_v16 = vld [vmem:[%s2090_s22 + $0x24] sm:$0xff] }
  0x1e   : > { %v810_v13 = vpack.c.bf16 %v801_v11, %v800_v10  ;;  %v2028_v14 = vld [vmem:[%s2693_s1 + $0x38] sm:$0xff]   ;;  %v932_v17 = vpack.c.bf16 %v802_v15, %v801_v11  ;;  %v811_v18 = vpack.c.bf16 %v803_v16, %v802_v15  ;;  %v2029_v19 = vld [vmem:[%s2693_s1 + $0x40] sm:$0xff]   ;;  %v1169_v44 = vld [vmem:[%s2090_s22 + $0x2e] sm:$0xff] }
  0x1f   : > { %v806_v24 = vld [vmem:[%s2090_s22 + $0x3c] sm:$0xff]  ;;  %v807_v25 = vld [vmem:[%s2090_s22 + $0x44] sm:$0xff] }
  0x20   : > { %v931_v32 = vld [vmem:[%s2090_s22 + $0x5c] sm:$0xff]  ;;  %v1046_v39 = vld [vmem:[%s2090_s22 + $0x25] sm:$0xff] }
  0x21   : > { %v1044_v33 = vld [vmem:[%s2090_s22 + $0x15] sm:$0xff]  ;;  %v1167_v38 = vld [vmem:[%s2090_s22 + $0x1e] sm:$0xff]  ;;  %v1168_v43 = vld [vmem:[%s2090_s22 + $0x26] sm:$0xff] }
  0x22   : > { %1800 = vmatmul.mubr.msk.bf16.gmra.mxu0 %vm251_vm1, %v239_v20  ;;  %v804_v20 = vld [vmem:[%s2090_s22 + $0x2c] sm:$0xff]  ;;  %v1166_v37 = vld [vmem:[%s2090_s22 + $0x16] sm:$0xff]  ;;  %v1175_v62 = vld [vmem:[%s2090_s22 + $0x5e] sm:$0xff] }
  0x23   : > { %1814 = vmatmul.mubr.msk.bf16.vlgmr.msra.gmra.mxu1 %vm251_vm1, %v220_v21  ;;  %1835 = vmatprep.mubr.msk.bf16.mxu0 %vm2039_vm0, %v2038_v1  ;;  %v805_v21 = vld [vmem:[%s2090_s22 + $0x34] sm:$0xff]  ;;  %v1053_v58 = vld [vmem:[%s2090_s22 + $0x5d] sm:$0xff] }
  0x24   : > { %1856 = vmatpush3.bf16.msra.mxu1 %v2024_v22  ;;  %1817 = vmatprep.mubr.msk.bf16.mxu1 %vm2039_vm0, %v2038_v1  ;;  %v933_v22 = vpack.c.bf16 %v804_v20, %v803_v16  ;;  %v812_v23 = vpack.c.bf16 %v805_v21, %v804_v20  ;;  %v934_v26 = vpack.c.bf16 %v806_v24, %v805_v21  ;;  %v1048_v45 = vld [vmem:[%s2090_s22 + $0x35] sm:$0xff] }
  0x25   : > { %1899 = vmatprep.subr.bf16.mxu1 %v2038_v1  ;;  %v1170_v49 = vld [vmem:[%s2090_s22 + $0x36] sm:$0xff] }
  0x2a   : > { %1836 = vmatmul.mubr.msk.bf16.vlgmr.msra.gmra.mxu0 %vm251_vm1, %v444_v27  ;;  %v813_v27 = vpack.c.bf16 %v807_v25, %v806_v24 }
  0x2b   : > { %1818 = vmatmul.mubr.msk.bf16.gmra.mxu1 %vm251_vm1, %v221_v28  ;;  %1878 = vmatpush3.bf16.msra.mxu0 %v2025_v29  ;;  %v808_v28 = vld [vmem:[%s2090_s22 + $0x4c] sm:$0xff]  ;;  %v809_v29 = vld [vmem:[%s2090_s22 + $0x54] sm:$0xff] }
  0x2c   : > { %1821 = vmatprep.mubr.msk.bf16.mxu1 %vm2039_vm0, %v2038_v1  ;;  %1839 = vmatprep.mubr.msk.bf16.mxu0 %vm2039_vm0, %v2038_v1  ;;  %v935_v30 = vpack.c.bf16 %v808_v28, %v807_v25  ;;  %v814_v31 = vpack.c.bf16 %v809_v29, %v808_v28 }
  0x2d   : > { %1921 = vmatprep.subr.bf16.mxu0 %v2038_v1 }
  0x32   : > { %1840 = vmatmul.mubr.msk.bf16.gmra.mxu0 %vm251_vm1, %v445_v34  ;;  %v1045_v34 = vld [vmem:[%s2090_s22 + $0x1d] sm:$0xff] }
  0x33   : > { %1822 = vmatmul.mubr.msk.bf16.gmra.mxu1 %vm251_vm1, %v222_v35  ;;  %1843 = vmatprep.mubr.msk.bf16.mxu0 %vm2039_vm0, %v2038_v1  ;;  %v936_v35 = vpack.c.bf16 %v931_v32, %v809_v29  ;;  %v1054_v36 = vpack.c.bf16 %v1045_v34, %v1044_v33 }
  0x34   : > { %1825 = vmatprep.mubr.msk.bf16.mxu1 %vm2039_vm0, %v2038_v1 }
  0x3a   : > { %1844 = vmatmul.mubr.msk.bf16.gmra.mxu0 %vm251_vm1, %v446_v40  ;;  %v1047_v40 = vld [vmem:[%s2090_s22 + $0x2d] sm:$0xff] }
  0x3b   : > { %1826 = vmatmul.mubr.msk.bf16.gmra.mxu1 %vm251_vm1, %v223_v41  ;;  %1847 = vmatprep.mubr.msk.bf16.mxu0 %vm2039_vm0, %v2038_v1  ;;  %v1176_v41 = vpack.c.bf16 %v1167_v38, %v1166_v37  ;;  %v1055_v42 = vpack.c.bf16 %v1047_v40, %v1046_v39 }
  0x3c   : > { %1829 = vmatprep.mubr.msk.bf16.mxu1 %vm2039_vm0, %v2038_v1 }
  0x42   : > { %1848 = vmatmul.mubr.msk.bf16.gmra.mxu0 %vm251_vm1, %v447_v46  ;;  %v1049_v46 = vld [vmem:[%s2090_s22 + $0x3d] sm:$0xff] }
  0x43   : > { %1830 = vmatmul.mubr.msk.bf16.gmra.mxu1 %vm251_vm1, %v224_v47  ;;  %1851 = vmatprep.mubr.msk.bf16.mxu0 %vm2039_vm0, %v2038_v1  ;;  %v1177_v47 = vpack.c.bf16 %v1169_v44, %v1168_v43  ;;  %v1056_v48 = vpack.c.bf16 %v1049_v46, %v1048_v45 }
  0x44   : > { %1857 = vmatprep.mubr.msk.bf16.mxu1 %vm2039_vm0, %v2038_v1 }
  0x4a   : > { %1852 = vmatmul.mubr.msk.bf16.gmra.mxu0 %vm251_vm1, %v448_v50  ;;  %v1171_v50 = vld [vmem:[%s2090_s22 + $0x3e] sm:$0xff] }
  0x4b   : > { %1858 = vmatmul.mubr.msk.bf16.vlgmr.msra.gmra.mxu1 %vm251_vm1, %v566_v51  ;;  %1879 = vmatprep.mubr.msk.bf16.mxu0 %vm2039_vm0, %v2038_v1  ;;  %v1050_v51 = vld [vmem:[%s2090_s22 + $0x45] sm:$0xff]  ;;  %v1178_v53 = vpack.c.bf16 %v1171_v50, %v1170_v49 }
  0x4c   : > { %1900 = vmatpush3.bf16.msra.mxu1 %v2026_v52  ;;  %1861 = vmatprep.mubr.msk.bf16.mxu1 %vm2039_vm0, %v2038_v1  ;;  %v1051_v52 = vld [vmem:[%s2090_s22 + $0x4d] sm:$0xff] }
  0x4d   : > { %1943 = vmatprep.subr.bf16.mxu1 %v2038_v1  ;;  %v1057_v54 = vpack.c.bf16 %v1051_v52, %v1050_v51 }
  0x52   : > { %1880 = vmatmul.mubr.msk.bf16.vlgmr.msra.gmra.mxu0 %vm251_vm1, %v688_v55  ;;  %v1172_v55 = vld [vmem:[%s2090_s22 + $0x46] sm:$0xff] }
  0x53   : > { %1862 = vmatmul.mubr.msk.bf16.gmra.mxu1 %vm251_vm1, %v567_v56  ;;  %1922 = vmatpush3.bf16.msra.mxu0 %v2027_v57  ;;  %v1173_v56 = vld [vmem:[%s2090_s22 + $0x4e] sm:$0xff] }
  0x54   : > { %1865 = vmatprep.mubr.msk.bf16.mxu1 %vm2039_vm0, %v2038_v1  ;;  %1883 = vmatprep.mubr.msk.bf16.mxu0 %vm2039_vm0, %v2038_v1  ;;  %v1052_v57 = vld [vmem:[%s2090_s22 + $0x55] sm:$0xff]  ;;  %v1179_v59 = vpack.c.bf16 %v1173_v56, %v1172_v55 }
  0x55   : > { %1965 = vmatprep.subr.bf16.mxu0 %v2038_v1 }
  0x5a   : > { %1884 = vmatmul.mubr.msk.bf16.gmra.mxu0 %vm251_vm1, %v689_v60  ;;  %v1058_v60 = vpack.c.bf16 %v1053_v58, %v1052_v57 }
  0x5b   : > { %1866 = vmatmul.mubr.msk.bf16.gmra.mxu1 %vm251_vm1, %v568_v61  ;;  %1887 = vmatprep.mubr.msk.bf16.mxu0 %vm2039_vm0, %v2038_v1  ;;  %v1174_v61 = vld [vmem:[%s2090_s22 + $0x56] sm:$0xff] }
  0x5c   : > { %1869 = vmatprep.mubr.msk.bf16.mxu1 %vm2039_vm0, %v2038_v1  ;;  %v1180_v63 = vpack.c.bf16 %v1175_v62, %v1174_v61 }
  0x62   : > { %1888 = vmatmul.mubr.msk.bf16.gmra.mxu0 %vm251_vm1, %v690_v0 }
  0x63   : > { %1870 = vmatmul.mubr.msk.bf16.gmra.mxu1 %vm251_vm1, %v569_v2  ;;  %1891 = vmatprep.mubr.msk.bf16.mxu0 %vm2039_vm0, %v2038_v1 }
  0x64   : > { %1873 = vmatprep.mubr.msk.bf16.mxu1 %vm2039_vm0, %v2038_v1 }
  0x6a   : > { %1892 = vmatmul.mubr.msk.bf16.gmra.mxu0 %vm251_vm1, %v691_v6 }
  0x6b   : > { %1874 = vmatmul.mubr.msk.bf16.gmra.mxu1 %vm251_vm1, %v570_v7  ;;  %1895 = vmatprep.mubr.msk.bf16.mxu0 %vm2039_vm0, %v2038_v1 }
  0x6c   : > { %1901 = vmatprep.mubr.msk.bf16.mxu1 %vm2039_vm0, %v2038_v1 }
  0x72   : > { %1896 = vmatmul.mubr.msk.bf16.gmra.mxu0 %vm251_vm1, %v692_v12 }
  0x73   : > { %1902 = vmatmul.mubr.msk.bf16.vlgmr.msra.gmra.mxu1 %vm251_vm1, %v810_v13  ;;  %1923 = vmatprep.mubr.msk.bf16.mxu0 %vm2039_vm0, %v2038_v1 }
  0x74   : > { %1944 = vmatpush3.bf16.msra.mxu1 %v2028_v14  ;;  %1905 = vmatprep.mubr.msk.bf16.mxu1 %vm2039_vm0, %v2038_v1 }
  0x7a   : > { %1924 = vmatmul.mubr.msk.bf16.vlgmr.msra.gmra.mxu0 %vm251_vm1, %v932_v17 }
  0x7b   : > { %1906 = vmatmul.mubr.msk.bf16.gmra.mxu1 %vm251_vm1, %v811_v18  ;;  %1966 = vmatpush3.bf16.msra.mxu0 %v2029_v19 }
  0x7c   : > { %1909 = vmatprep.mubr.msk.bf16.mxu1 %vm2039_vm0, %v2038_v1  ;;  %1927 = vmatprep.mubr.msk.bf16.mxu0 %vm2039_vm0, %v2038_v1 }
  0x82   : > { %1928 = vmatmul.mubr.msk.bf16.gmra.mxu0 %vm251_vm1, %v933_v22 }
  0x83   : > { %1910 = vmatmul.mubr.msk.bf16.gmra.mxu1 %vm251_vm1, %v812_v23  ;;  %1931 = vmatprep.mubr.msk.bf16.mxu0 %vm2039_vm0, %v2038_v1 }
  0x84   : > { %1913 = vmatprep.mubr.msk.bf16.mxu1 %vm2039_vm0, %v2038_v1 }
  0x8a   : > { %1932 = vmatmul.mubr.msk.bf16.gmra.mxu0 %vm251_vm1, %v934_v26 }
  0x8b   : > { %1914 = vmatmul.mubr.msk.bf16.gmra.mxu1 %vm251_vm1, %v813_v27  ;;  %1935 = vmatprep.mubr.msk.bf16.mxu0 %vm2039_vm0, %v2038_v1 }
  0x8c   : > { %1917 = vmatprep.mubr.msk.bf16.mxu1 %vm2039_vm0, %v2038_v1 }
  0x92   : > { %1936 = vmatmul.mubr.msk.bf16.gmra.mxu0 %vm251_vm1, %v935_v30 }
  0x93   : > { %1918 = vmatmul.mubr.msk.bf16.gmra.mxu1 %vm251_vm1, %v814_v31  ;;  %1939 = vmatprep.mubr.msk.bf16.mxu0 %vm2039_vm0, %v2038_v1 }
  0x94   : > { %1945 = vmatprep.mubr.msk.bf16.mxu1 %vm2039_vm0, %v2038_v1 }
  0x9a   : > { %1940 = vmatmul.mubr.msk.bf16.gmra.mxu0 %vm251_vm1, %v936_v35 }
  0x9b   : > { %1946 = vmatmul.mubr.msk.bf16.vlgmr.msra.gmra.mxu1 %vm251_vm1, %v1054_v36  ;;  %1967 = vmatprep.mubr.msk.bf16.mxu0 %vm2039_vm0, %v2038_v1 }
  0x9c   : > { %1949 = vmatprep.mubr.msk.bf16.mxu1 %vm2039_vm0, %v2038_v1 }
  0xa2   : > { %1968 = vmatmul.mubr.msk.bf16.vlgmr.msra.gmra.mxu0 %vm251_vm1, %v1176_v41 }
  0xa3   : > { %1950 = vmatmul.mubr.msk.bf16.gmra.mxu1 %vm251_vm1, %v1055_v42  ;;  %1971 = vmatprep.mubr.msk.bf16.mxu0 %vm2039_vm0, %v2038_v1 }
  0xa4   : > { %1953 = vmatprep.mubr.msk.bf16.mxu1 %vm2039_vm0, %v2038_v1 }
  0xaa   : > { %1972 = vmatmul.mubr.msk.bf16.gmra.mxu0 %vm251_vm1, %v1177_v47 }
  0xab   : > { %1954 = vmatmul.mubr.msk.bf16.gmra.mxu1 %vm251_vm1, %v1056_v48  ;;  %1975 = vmatprep.mubr.msk.bf16.mxu0 %vm2039_vm0, %v2038_v1 }
  0xac   : > { %1957 = vmatprep.mubr.msk.bf16.mxu1 %vm2039_vm0, %v2038_v1 }
  0xb2   : > { %1976 = vmatmul.mubr.msk.bf16.gmra.mxu0 %vm251_vm1, %v1178_v53 }
  0xb3   : > { %1958 = vmatmul.mubr.msk.bf16.gmra.mxu1 %vm251_vm1, %v1057_v54  ;;  %1979 = vmatprep.mubr.msk.bf16.mxu0 %vm2039_vm0, %v2038_v1 }
  0xb4   : > { %1961 = vmatprep.mubr.msk.bf16.mxu1 %vm2039_vm0, %v2038_v1 }
  0xba   : > { %1980 = vmatmul.mubr.msk.bf16.gmra.mxu0 %vm251_vm1, %v1179_v59 }
  0xbb   : > { %1962 = vmatmul.mubr.msk.bf16.gmra.mxu1 %vm251_vm1, %v1058_v60  ;;  %1983 = vmatprep.mubr.msk.bf16.mxu0 %vm2039_vm0, %v2038_v1 }
  0xc2   : > { %1984 = vmatmul.mubr.msk.bf16.gmra.mxu0 %vm251_vm1, %v1180_v63 }
  0xd2   : > { %v301_v0 = vpop.f32.mrf.mxu0 }
  0xd3   : > { %v325_v2 = vpop.f32.mrf.mxu1 }
  0xd4   : > { %v1793_v3 = vpop.f32.mrf.mxu0 }
  0xd5   : > { %v1805_v4 = vpop.f32.mrf.mxu1 }
  0xd6   : > { %v304_v5 = vpop.f32.mrf.mxu0 }
  0xd7   : > { %v328_v6 = vpop.f32.mrf.mxu1 }
  0xd8   : > { %v1794_v7 = vpop.f32.mrf.mxu0 }
  0xd9   : > { %v1806_v8 = vpop.f32.mrf.mxu1 }
  0xda   : > { %v309_v9 = vpop.f32.mrf.mxu0 }
  0xdb   : > { %v333_v10 = vpop.f32.mrf.mxu1 }
  0xdc   : > { %v1797_v11 = vpop.f32.mrf.mxu0 }
  0xdd   : > { %v1809_v12 = vpop.f32.mrf.mxu1 }
  0xde   : > { %v312_v13 = vpop.f32.mrf.mxu0 }
  0xdf   : > { %v336_v14 = vpop.f32.mrf.mxu1 }
  0xe0   : > { %v1798_v1 = vpop.f32.mrf.mxu0 }
  0xe1   : > { %v1810_v15 = vpop.f32.mrf.mxu1 }
  0xe2   : > { %v317_v16 = vpop.f32.mrf.mxu0 }
  0xe3   : > { %v395_v17 = vpop.f32.mrf.mxu1 }
  0xe4   : > { %v396_v18 = vadd.f32 %v395_v17, %v301_v0  ;;  %v1801_v19 = vpop.f32.mrf.mxu0 }
  0xe5   : > { %v1815_v20 = vpop.f32.mrf.mxu1 }
  0xe6   : > { %v320_v21 = vpop.f32.mrf.mxu0 }
  0xe7   : > { %v398_v22 = vpop.f32.mrf.mxu1 }
  0xe8   : > { %v399_v23 = vadd.f32 %v398_v22, %v304_v5  ;;  %v1802_v24 = vpop.f32.mrf.mxu0 }
  0xe9   : > { %v1816_v25 = vpop.f32.mrf.mxu1 }
  0xea   : > { %v507_v26 = vpop.f32.mrf.mxu0 }
  0xeb   : > { %v403_v27 = vpop.f32.mrf.mxu1  ;;  %v546_v28 = vadd.f32 %v507_v26, %v396_v18 }
  0xec   : > { %v404_v29 = vadd.f32 %v403_v27, %v309_v9  ;;  %v1837_v30 = vpop.f32.mrf.mxu0 }
  0xed   : > { %v1819_v31 = vpop.f32.mrf.mxu1 }
  0xee   : > { %v510_v32 = vpop.f32.mrf.mxu0 }
  0xef   : > { %v406_v33 = vpop.f32.mrf.mxu1  ;;  %v547_v34 = vadd.f32 %v510_v32, %v399_v23 }
  0xf0   : > { %v407_v35 = vadd.f32 %v406_v33, %v312_v13  ;;  %v1838_v36 = vpop.f32.mrf.mxu0 }
  0xf1   : > { %v1820_v37 = vpop.f32.mrf.mxu1 }
  0xf2   : > { %v515_v38 = vpop.f32.mrf.mxu0 }
  0xf3   : > { %v411_v39 = vpop.f32.mrf.mxu1  ;;  %v548_v40 = vadd.f32 %v515_v38, %v404_v29 }
  0xf4   : > { %v412_v41 = vadd.f32 %v411_v39, %v317_v16  ;;  %v1841_v42 = vpop.f32.mrf.mxu0 }
  0xf5   : > { %v1823_v43 = vpop.f32.mrf.mxu1 }
  0xf6   : > { %v518_v44 = vpop.f32.mrf.mxu0 }
  0xf7   : > { %v414_v45 = vpop.f32.mrf.mxu1  ;;  %v549_v46 = vadd.f32 %v518_v44, %v407_v35 }
  0xf8   : > { %v415_v47 = vadd.f32 %v414_v45, %v320_v21  ;;  %v1842_v48 = vpop.f32.mrf.mxu0 }
  0xf9   : > { %v1824_v49 = vpop.f32.mrf.mxu1 }
  0xfa   : > { %v523_v50 = vpop.f32.mrf.mxu0 }
  0xfb   : > { %v419_v51 = vpop.f32.mrf.mxu1  ;;  %v550_v52 = vadd.f32 %v523_v50, %v412_v41 }
  0xfc   : > { %v420_v53 = vadd.f32 %v419_v51, %v325_v2  ;;  %v1845_v54 = vpop.f32.mrf.mxu0 }
  0xfd   : > { %v1827_v55 = vpop.f32.mrf.mxu1 }
  0xfe   : > { %v526_v56 = vpop.f32.mrf.mxu0 }
  0xff   : > { %v422_v57 = vpop.f32.mrf.mxu1  ;;  %v551_v58 = vadd.f32 %v526_v56, %v415_v47 }
 0x100   : > { %v423_v59 = vadd.f32 %v422_v57, %v328_v6  ;;  %v1846_v60 = vpop.f32.mrf.mxu0 }
 0x101   : > { %v1828_v61 = vpop.f32.mrf.mxu1 }
 0x102   : > { %v531_v62 = vpop.f32.mrf.mxu0 }
 0x103   : > { %v427_v63 = vpop.f32.mrf.mxu1  ;;  %v552_v0 = vadd.f32 %v531_v62, %v420_v53 }
 0x104   : > { %v428_v3 = vadd.f32 %v427_v63, %v333_v10  ;;  %v1849_v4 = vpop.f32.mrf.mxu0 }
 0x105   : > { %v1831_v5 = vpop.f32.mrf.mxu1 }
 0x106   : > { %v534_v7 = vpop.f32.mrf.mxu0 }
 0x107   : > { %v430_v8 = vpop.f32.mrf.mxu1  ;;  %v553_v9 = vadd.f32 %v534_v7, %v423_v59 }
 0x108   : > { %v431_v11 = vadd.f32 %v430_v8, %v336_v14  ;;  %v1850_v12 = vpop.f32.mrf.mxu0 }
 0x109   : > { %v1832_v2 = vpop.f32.mrf.mxu1 }
 0x10a   : > { %v539_v13 = vpop.f32.mrf.mxu0 }
 0x10b   : > { %v554_v1 = vadd.f32 %v539_v13, %v428_v3  ;;  %v629_v15 = vpop.f32.mrf.mxu1 }
 0x10c   : > { %v668_v16 = vadd.f32 %v629_v15, %v546_v28  ;;  %v1853_v17 = vpop.f32.mrf.mxu0 }
 0x10d   : > { %v1859_v6 = vpop.f32.mrf.mxu1 }
 0x10e   : > { %v542_v18 = vpop.f32.mrf.mxu0 }
 0x10f   : > { %v555_v19 = vadd.f32 %v542_v18, %v431_v11  ;;  %v632_v20 = vpop.f32.mrf.mxu1 }
 0x110   : > { %v669_v21 = vadd.f32 %v632_v20, %v547_v34  ;;  %v1854_v22 = vpop.f32.mrf.mxu0 }
 0x111   : > { %v1860_v10 = vpop.f32.mrf.mxu1 }
 0x112   : > { %v751_v23 = vpop.f32.mrf.mxu0 }
 0x113   : > { %v637_v24 = vpop.f32.mrf.mxu1  ;;  %v2325_v25 = vadd.f32 %v751_v23, %v668_v16 }
 0x114   : > { %v670_v26 = vadd.f32 %v637_v24, %v548_v40  ;;  %v1881_v14 = vpop.f32.mrf.mxu0 }
 0x115   : > { %v1863_v27 = vpop.f32.mrf.mxu1 }
 0x116   : > { %v754_v29 = vpop.f32.mrf.mxu0 }
 0x117   : > { %v640_v30 = vpop.f32.mrf.mxu1  ;;  %v2327_v31 = vadd.f32 %v754_v29, %v669_v21  ;;  %v1315_v21 = vlaneseq }
 0x118   : > { %v671_v28 = vadd.f32 %v640_v30, %v549_v46  ;;  %v1882_v32 = vpop.f32.mrf.mxu0 }
 0x119   : > { %v1864_v33 = vpop.f32.mrf.mxu1 }
 0x11a   : > { %v759_v35 = vpop.f32.mrf.mxu0 }
 0x11b   : > { %v645_v36 = vpop.f32.mrf.mxu1  ;;  %v2329_v37 = vadd.f32 %v759_v35, %v670_v26  ;;  %v2357_v26 = vshrl.u32 %v1315_v21, 7 }
 0x11c   : > { %v672_v34 = vadd.f32 %v645_v36, %v550_v52  ;;  %v1885_v38 = vpop.f32.mrf.mxu0 }
 0x11d   : > { %v1867_v39 = vpop.f32.mrf.mxu1  ;;  %v1317_v29 = vadd.s32 8, %v2357_v26  ;;  %v2365_v33 = vmul.u32.u64.low 3435973837, %v2357_v26  ;;  %v2366_v35 = vmul.u32.u64.high 3435973837, %v2357_v26, %v2365_v33  ;;  %v2410_v21 = vadd.s32 40, %v2357_v26 }
 0x11e   : > { %v762_v41 = vpop.f32.mrf.mxu0 }
 0x11f   : > { %v648_v42 = vpop.f32.mrf.mxu1  ;;  %v2331_v43 = vadd.f32 %v762_v41, %v671_v28  ;;  %v1318_v41 = vadd.s32 16, %v2357_v26 }
 0x120   : > { %v673_v40 = vadd.f32 %v648_v42, %v551_v58  ;;  %v1886_v44 = vpop.f32.mrf.mxu0 }
 0x121   : > { %v1868_v45 = vpop.f32.mrf.mxu1  ;;  %v1319_v44 = vadd.s32 24, %v2357_v26 }
 0x122   : > { %v767_v47 = vpop.f32.mrf.mxu0 }
 0x123   : > { %v653_v48 = vpop.f32.mrf.mxu1  ;;  %v2333_v49 = vadd.f32 %v767_v47, %v672_v34  ;;  %v2370_v34 = vmul.u32.u64.low 3435973837, %v1317_v29  ;;  %v2371_v38 = vmul.u32.u64.high 3435973837, %v1317_v29, %v2370_v34 }
 0x124   : > { %v674_v46 = vadd.f32 %v653_v48, %v552_v0  ;;  %v1889_v50 = vpop.f32.mrf.mxu0 }
 0x125   : > { %v1871_v51 = vpop.f32.mrf.mxu1 }
 0x126   : > { %v770_v53 = vpop.f32.mrf.mxu0 }
 0x127   : > { %v656_v54 = vpop.f32.mrf.mxu1  ;;  %v2335_v55 = vadd.f32 %v770_v53, %v673_v40  ;;  %v1332_v53 = vshrl.u32 %v2366_v35, 3 }
 0x128   : > { %v675_v52 = vadd.f32 %v656_v54, %v553_v9  ;;  %v1890_v56 = vpop.f32.mrf.mxu0 }
 0x129   : > { %v1872_v57 = vpop.f32.mrf.mxu1 }
 0x12a   : > { %v775_v59 = vpop.f32.mrf.mxu0  ;;  %v1343_v57 = vshrl.u32 %v2371_v38, 3 }
 0x12b   : > { %v661_v60 = vpop.f32.mrf.mxu1  ;;  %v2337_v61 = vadd.f32 %v775_v59, %v674_v46  ;;  %v2381_v48 = vmul.u32.u64.low 3435973837, %v1318_v41  ;;  %v2382_v46 = vmul.u32.u64.high 3435973837, %v1318_v41, %v2381_v48 }
 0x12c   : > { %v676_v58 = vadd.f32 %v661_v60, %v554_v1  ;;  %v1893_v62 = vpop.f32.mrf.mxu0  ;;  %v2394_v60 = vadd.s32 32, %v2357_v26 }
 0x12d   : > { %v1875_v63 = vpop.f32.mrf.mxu1 }
 0x12e   : > { %v778_v3 = vpop.f32.mrf.mxu0  ;;  %v1333_v63 = vmul.u32 10, %v1332_v53 }
 0x12f   : > { %v664_v4 = vpop.f32.mrf.mxu1  ;;  %v2339_v5 = vadd.f32 %v778_v3, %v675_v52  ;;  %v2385_v54 = vmul.u32.u64.low 3435973837, %v1319_v44  ;;  %v2386_v52 = vmul.u32.u64.high 3435973837, %v1319_v44, %v2385_v54 }
 0x130   : > { %v677_v0 = vadd.f32 %v664_v4, %v555_v19  ;;  %v1894_v7 = vpop.f32.mrf.mxu0  ;;  %v1344_v4 = vmul.u32 10, %v1343_v57 }
 0x131   : > { %v1876_v8 = vpop.f32.mrf.mxu1  ;;  %v1354_v7 = vshrl.u32 %v2382_v46, 3 }
 0x132   : > { %v783_v11 = vpop.f32.mrf.mxu0 }
 0x133   : > { %v2341_v12 = vadd.f32 %v783_v11, %v676_v58  ;;  %v2343_v9 = vpop.f32.mrf.mxu1  ;;  %v2402_v8 = vmul.u32.u64.low 3435973837, %v2394_v60  ;;  %v2403_v11 = vmul.u32.u64.high 3435973837, %v2394_v60, %v2402_v8 }
 0x134   : > { %v1897_v2 = vpop.f32.mrf.mxu0 }
 0x135   : > { %v1903_v13 = vpop.f32.mrf.mxu1 }
 0x136   : > { %v786_v15 = vpop.f32.mrf.mxu0 }
 0x137   : > { %v2345_v16 = vadd.f32 %v786_v15, %v677_v0  ;;  %v2347_v1 = vpop.f32.mrf.mxu1  ;;  %v1334_v15 = vsub.s32 %v2357_v26, %v1333_v63  ;;  %v2445_v63 = vadd.s32 56, %v2357_v26 }
 0x138   : > { %v1898_v17 = vpop.f32.mrf.mxu0 }
 0x139   : > { %v1904_v6 = vpop.f32.mrf.mxu1  ;;  %v1365_v17 = vshrl.u32 %v2386_v52, 3  ;;  %vm1436_vm2 = vcmp.ne.s32.totalorder %v1334_v15, 0  ;;  %vm1446_vm3 = vcmp.lt.s32.totalorder %v1334_v15, 0  ;;  %v912_v52 = vadd.f32 %v2343_v9, %v2325_v25 }
 0x13a   : > { %v2349_v18 = vpop.f32.mrf.mxu0  ;;  %vm2426_vm6 = vmand %vm1446_vm3, %vm1436_vm2 }
 0x13b   : > { %v2351_v20 = vpop.f32.mrf.mxu1  ;;  %v1366_v33 = vmul.u32 10, %v1365_v17 }
 0x13c   : > { %v1925_v19 = vpop.f32.mrf.mxu0  ;;  %v914_v46 = vadd.f32 %v2351_v20, %v2329_v37 }
 0x13d   : > { %v1907_v22 = vpop.f32.mrf.mxu1  ;;  %v1345_v19 = vsub.s32 %v1317_v29, %v1344_v4  ;;  %v2420_v29 = vmul.u32.u64.low 3435973837, %v2410_v21  ;;  %v2421_v34 = vmul.u32.u64.high 3435973837, %v2410_v21, %v2420_v29  ;;  %v1034_v4 = vadd.f32 %v2349_v18, %v912_v52 }
 0x13e   : > { %v2353_v10 = vpop.f32.mrf.mxu0 }
 0x13f   : > { %v2355_v23 = vpop.f32.mrf.mxu1  ;;  %vm1437_vm4 = vcmp.ne.s32.totalorder %v1345_v19, 0  ;;  %vm1447_vm5 = vcmp.lt.s32.totalorder %v1345_v19, 0 }
 0x140   : > { %v1926_v24 = vpop.f32.mrf.mxu0  ;;  %vm2436_vm7 = vmand %vm1447_vm5, %vm1437_vm4 }
 0x141   : > { %v1908_v14 = vpop.f32.mrf.mxu1  ;;  %v1355_v24 = vmul.u32 10, %v1354_v7 }
 0x142   : > { %v2359_v27 = vpop.f32.mrf.mxu0 }
 0x143   : > { %v2362_v30 = vpop.f32.mrf.mxu1 }
 0x144   : > { %v1929_v28 = vpop.f32.mrf.mxu0 }
 0x145   : > { %v1911_v32 = vpop.f32.mrf.mxu1  ;;  %v2415_v28 = vadd.s32 48, %v2357_v26 }
 0x146   : > { %v2368_v36 = vpop.f32.mrf.mxu0 }
 0x147   : > { %v2373_v39 = vpop.f32.mrf.mxu1  ;;  %v2431_v53 = vmul.u32.u64.low 3435973837, %v2415_v28  ;;  %v2432_v54 = vmul.u32.u64.high 3435973837, %v2415_v28, %v2431_v53 }
 0x148   : > { %v1930_v42 = vpop.f32.mrf.mxu0 }
 0x149   : > { %v1912_v40 = vpop.f32.mrf.mxu1  ;;  %v2423_v42 = vsub.s32 %v1318_v41, %v1355_v24  ;;  %v2463_v24 = vld [vmem:[%s2694_s2] ss:$0 sm:$0xff] }
 0x14a   : > { %v2377_v45 = vpop.f32.mrf.mxu0  ;;  %v1376_v40 = vshrl.u32 %v2403_v11, 3 }
 0x14b   : > { %v2379_v47 = vpop.f32.mrf.mxu1  ;;  %vm1438_vm8 = vcmp.ne.s32.totalorder %v2423_v42, 0  ;;  %vm1448_vm9 = vcmp.lt.s32.totalorder %v2423_v42, 0  ;;  %v1468_v11 = vadd.s32 10, %v2423_v42 }
 0x14c   : > { %v1933_v50 = vpop.f32.mrf.mxu0  ;;  %v1377_v25 = vmul.u32 10, %v1376_v40  ;;  %vm2469_vm12 = vmand %vm1448_vm9, %vm1438_vm8 }
 0x14d   : > { %v1915_v51 = vpop.f32.mrf.mxu1  ;;  %v1466_v50 = vadd.s32 10, %v1334_v15  ;;  %v1478_v52 = vsel %vm2469_vm12, %v1468_v11, %v2423_v42  ;;  %v915_v11 = vadd.f32 %v2355_v23, %v2331_v43 }
 0x14e   : > { %v2388_v56 = vpop.f32.mrf.mxu0  ;;  %v1467_v51 = vadd.s32 10, %v1345_v19  ;;  %vm2525_vm2 = vcmp.lt.s32.totalorder %v1478_v52, 8 }
 0x14f   : > { %v2391_v59 = vpop.f32.mrf.mxu1  ;;  %v1476_v8 = vsel %vm2426_vm6, %v1466_v50, %v1334_v15  ;;  %v1037_v23 = vadd.f32 %v2368_v36, %v915_v11  ;;  %v916_v36 = vadd.f32 %v2362_v30, %v2333_v49 }
 0x150   : > { %v1934_v58 = vpop.f32.mrf.mxu0  ;;  %vm2490_vm13 = vcmp.lt.s32.totalorder %v1476_v8, 8 }
 0x151   : > { %v1916_v62 = vpop.f32.mrf.mxu1  ;;  %v2440_v58 = vsub.s32 %v1319_v44, %v1366_v33  ;;  %v1477_v44 = vsel %vm2436_vm7, %v1467_v51, %v1345_v19 }
 0x152   : > { %v2396_v3 = vpop.f32.mrf.mxu0  ;;  %vm2494_vm14 = vcmp.lt.s32.totalorder %v1477_v44, 8 }
 0x153   : > { %v2398_v0 = vpop.f32.mrf.mxu1  ;;  %vm1439_vm10 = vcmp.ne.s32.totalorder %v2440_v58, 0  ;;  %vm1449_vm11 = vcmp.lt.s32.totalorder %v2440_v58, 0 }
 0x154   : > { %v1937_v2 = vpop.f32.mrf.mxu0  ;;  %vm2510_vm15 = vmand %vm1449_vm11, %vm1439_vm10 }
 0x155   : > { %v1919_v13 = vpop.f32.mrf.mxu1  ;;  %v913_v2 = vadd.f32 %v2347_v1, %v2327_v31  ;;  %v1387_v31 = vshrl.u32 %v2421_v34, 3  ;;  %v2475_v1 = vmul.u32.u64.low 3435973837, %v2445_v63  ;;  %v2476_v19 = vmul.u32.u64.high 3435973837, %v2445_v63, %v2475_v1 }
 0x156   : > { %v2407_v6 = vpop.f32.mrf.mxu0 }
 0x157   : > { %v2412_v22 = vpop.f32.mrf.mxu1  ;;  %v1388_v41 = vmul.u32 10, %v1387_v31  ;;  %v1409_v1 = vshrl.u32 %v2476_v19, 3 }
 0x158   : > { %v1938_v14 = vpop.f32.mrf.mxu0 }
 0x159   : > { %v1920_v32 = vpop.f32.mrf.mxu1  ;;  %v2479_v14 = vadd.s32 64, %v2357_v26 }
 0x15a   : > { %v2417_v35 = vpop.f32.mrf.mxu0  ;;  %v1035_v32 = vadd.f32 %v2353_v10, %v913_v2  ;;  %v1469_v10 = vadd.s32 10, %v2440_v58 }
 0x15b   : > { %v1117_v38 = vpop.f32.mrf.mxu1  ;;  %v2515_v37 = vmul.u32.u64.low 3435973837, %v2479_v14  ;;  %v2516_v20 = vmul.u32.u64.high 3435973837, %v2479_v14, %v2515_v37 }
 0x15c   : > { %v1941_v48 = vpop.f32.mrf.mxu0  ;;  %v1156_v18 = vadd.f32 %v1117_v38, %v1034_v4  ;;  %v2483_v38 = vsub.s32 %v2394_v60, %v1377_v25  ;;  %v1398_v60 = vshrl.u32 %v2432_v54, 3  ;;  %v2519_v4 = vadd.s32 72, %v2357_v26 }
 0x15d   : > { %v1947_v57 = vpop.f32.mrf.mxu1  ;;  %v1479_v26 = vsel %vm2510_vm15, %v1469_v10, %v2440_v58  ;;  %v2545_v58 = vsub.s32 %v2410_v21, %v1388_v41  ;;  %v1038_v41 = vadd.f32 %v2377_v45, %v916_v36 }
 0x15e   : > { %v2442_v62 = vpop.f32.mrf.mxu0  ;;  %vm1440_vm0 = vcmp.ne.s32.totalorder %v2483_v38, 0  ;;  %vm1450_vm1 = vcmp.lt.s32.totalorder %v2483_v38, 0  ;;  %v2533_v44 = vadd.s32 10, %v2483_v38  ;;  %vm2556_vm4 = vcmp.lt.s32.totalorder %v1479_v26, 8 }
 0x15f   : > { %v1120_v7 = vpop.f32.mrf.mxu1  ;;  %vm2540_vm3 = vmand %vm1450_vm1, %vm1440_vm0  ;;  %vm1441_vm5 = vcmp.ne.s32.totalorder %v2545_v58, 0  ;;  %vm1451_vm6 = vcmp.lt.s32.totalorder %v2545_v58, 0 }
 0x160   : > { %v1942_v9 = vpop.f32.mrf.mxu0  ;;  %v1157_v50 = vadd.f32 %v1120_v7, %v1035_v32  ;;  %v1036_v7 = vadd.f32 %v2359_v27, %v914_v46  ;;  %v1399_v27 = vmul.u32 10, %v1398_v60  ;;  %vm2585_vm9 = vmand %vm1451_vm6, %vm1441_vm5 }
 0x161   : > { %v1948_v13 = vpop.f32.mrf.mxu1  ;;  %v2549_v32 = vmul.u32.u64.low 3435973837, %v2519_v4  ;;  %v2550_v43 = vmul.u32.u64.high 3435973837, %v2519_v4, %v2549_v32 }
 0x162   : > { %v1239_v17 = vpop.f32.mrf.mxu0  ;;  %v2561_v46 = vsub.s32 %v2415_v28, %v1399_v27  ;;  %v1420_v28 = vshrl.u32 %v2516_v20, 3  ;;  %v917_v20 = vadd.f32 %v2373_v39, %v2335_v55 }
 0x163   : > { %v1125_v33 = vpop.f32.mrf.mxu1  ;;  %v1278_v29 = vadd.f32 %v1239_v17, %v1156_v18  ;;  %v1431_v55 = vshrl.u32 %v2550_v43, 3  ;;  %v918_v43 = vadd.f32 %v2379_v47, %v2337_v61 }
 0x164   : > { %v1969_v40 = vpop.f32.mrf.mxu0  ;;  %v1158_v2 = vadd.f32 %v1125_v33, %v1036_v7  ;;  %vm1442_vm7 = vcmp.ne.s32.totalorder %v2561_v46, 0  ;;  %vm1452_vm8 = vcmp.lt.s32.totalorder %v2561_v46, 0  ;;  %v1039_v39 = vadd.f32 %v2388_v56, %v917_v20 }
 0x165   : > { %v1295_v51 = vadd.f32 %v2463_v24, %v1278_v29  ;;  %v1951_v53 = vpop.f32.mrf.mxu1  ;;  %v1472_v32 = vadd.s32 10, %v2561_v46  ;;  %vm2612_vm11 = vmand %vm1452_vm8, %vm1442_vm7  ;;  %v1432_v47 = vmul.u32 10, %v1431_v55  ;;  %v920_v20 = vadd.f32 %v2398_v0, %v2341_v12 }
 0x166   : > { %v1242_v54 = vpop.f32.mrf.mxu0  ;;  %v1480_v53 = vsel %vm2540_vm3, %v2533_v44, %v2483_v38 }
 0x167   : > { %1305 = vst [vmem:[%s2488_s20] sm:$0xff] %v1295_v51  ;;  %v1128_v42 = vpop.f32.mrf.mxu1  ;;  %v1279_v25 = vadd.f32 %v1242_v54, %v1157_v50  ;;  %v1516_v18 = vsel %vm2490_vm13, %v1295_v51, 0.0  ;;  %v1410_v54 = vmul.u32 10, %v1409_v1  ;;  %vm2597_vm10 = vcmp.lt.s32.totalorder %v1480_v53, 8 }
 0x168   : > { %v1970_v9 = vpop.f32.mrf.mxu0  ;;  %v1542_v21 = vmul.f32 %v1516_v18, %v1516_v18  ;;  %v1159_v50 = vadd.f32 %v1128_v42, %v1037_v23  ;;  %v1042_v12 = vadd.f32 %v2417_v35, %v920_v20 }
 0x169   : > { %v1296_v13 = vadd.f32 %v2463_v24, %v1279_v25  ;;  %v1952_v17 = vpop.f32.mrf.mxu1  ;;  %v1471_v25 = vadd.s32 10, %v2545_v58  ;;  %v2590_v11 = vsub.s32 %v2445_v63, %v1410_v54 }
 0x16a   : > { %v1247_v15 = vpop.f32.mrf.mxu0 }
 0x16b   : > { %1306 = vst [vmem:[%s2488_s20 + $0x8] sm:$0xff] %v1296_v13  ;;  %v1517_v33 = vsel %vm2494_vm14, %v1296_v13, 0.0  ;;  %v1133_v29 = vpop.f32.mrf.mxu1  ;;  %v1280_v34 = vadd.f32 %v1247_v15, %v1158_v2  ;;  %v1421_v2 = vmul.u32 10, %v1420_v28  ;;  %vm1443_vm12 = vcmp.ne.s32.totalorder %v2590_v11, 0 }
 0x16c   : > { %v1526_v10 = vadd.f32 %v1517_v33, %v1516_v18  ;;  %v1543_v19 = vmul.f32 %v1517_v33, %v1517_v33  ;;  %v1973_v60 = vpop.f32.mrf.mxu0  ;;  %v1160_v45 = vadd.f32 %v1133_v29, %v1038_v41  ;;  %v1481_v29 = vsel %vm2585_vm9, %v1471_v25, %v2545_v58 }
 0x16d   : > { %v1297_v48 = vadd.f32 %v2463_v24, %v1280_v34  ;;  %v1955_v51 = vpop.f32.mrf.mxu1  ;;  %v2618_v61 = vsub.s32 %v2479_v14, %v1421_v2  ;;  %vm1453_vm13 = vcmp.lt.s32.totalorder %v2590_v11, 0  ;;  %vm2625_vm14 = vcmp.lt.s32.totalorder %v1481_v29, 8 }
 0x16e   : > { %v1552_v52 = vadd.f32 %v1543_v19, %v1542_v21  ;;  %v1250_v57 = vpop.f32.mrf.mxu0  ;;  %v919_v51 = vadd.f32 %v2391_v59, %v2339_v5  ;;  %v1473_v54 = vadd.s32 10, %v2590_v11  ;;  %vm2638_vm15 = vmand %vm1453_vm13, %vm1443_vm12  ;;  %v1433_v5 = vsub.s32 %v2519_v4, %v1432_v47 }
 0x16f   : > { %1307 = vst [vmem:[%s2488_s20 + $0x10] sm:$0xff] %v1297_v48  ;;  %v1518_v49 = vsel %vm2525_vm2, %v1297_v48, 0.0  ;;  %v1136_v30 = vpop.f32.mrf.mxu1  ;;  %v1281_v37 = vadd.f32 %v1250_v57, %v1159_v50  ;;  %vm1444_vm0 = vcmp.ne.s32.totalorder %v2618_v61, 0  ;;  %vm1454_vm1 = vcmp.lt.s32.totalorder %v2618_v61, 0 }
 0x170   : > { %v1527_v7 = vadd.f32 %v1526_v10, %v1518_v49  ;;  %v1544_v42 = vmul.f32 %v1518_v49, %v1518_v49  ;;  %v1974_v38 = vpop.f32.mrf.mxu0  ;;  %v1161_v56 = vadd.f32 %v1136_v30, %v1039_v39  ;;  %v1040_v10 = vadd.f32 %v2396_v3, %v918_v43  ;;  %vm2660_vm3 = vmand %vm1454_vm1, %vm1444_vm0 }
 0x171   : > { %v1298_v9 = vadd.f32 %v2463_v24, %v1281_v37  ;;  %v1956_v8 = vpop.f32.mrf.mxu1  ;;  %v1482_v3 = vsel %vm2612_vm11, %v1472_v32, %v2561_v46  ;;  %v1041_v59 = vadd.f32 %v2407_v6, %v919_v51  ;;  %v1474_v25 = vadd.s32 10, %v2618_v61 }
 0x172   : > { %v1553_v26 = vadd.f32 %v1552_v52, %v1544_v42  ;;  %v1255_v44 = vpop.f32.mrf.mxu0  ;;  %vm1492_vm2 = vcmp.lt.s32.totalorder %v1482_v3, 8  ;;  %vm1455_vm5 = vcmp.lt.s32.totalorder %v1433_v5, 0 }
 0x173   : > { %1308 = vst [vmem:[%s2488_s20 + $0x18] sm:$0xff] %v1298_v9  ;;  %v1519_v18 = vsel %vm2556_vm4, %v1298_v9, 0.0  ;;  %v1141_v13 = vpop.f32.mrf.mxu1  ;;  %v1282_v17 = vadd.f32 %v1255_v44, %v1160_v45  ;;  %v1483_v9 = vsel %vm2638_vm15, %v1473_v54, %v2590_v11  ;;  %vm1445_vm4 = vcmp.ne.s32.totalorder %v1433_v5, 0 }
 0x174   : > { %v1528_v15 = vadd.f32 %v1527_v7, %v1519_v18  ;;  %v1545_v31 = vmul.f32 %v1519_v18, %v1519_v18  ;;  %v1977_v63 = vpop.f32.mrf.mxu0  ;;  %v1162_v53 = vadd.f32 %v1141_v13, %v1040_v10  ;;  %vm1493_vm6 = vcmp.lt.s32.totalorder %v1483_v9, 8  ;;  %vm2673_vm7 = vmand %vm1455_vm5, %vm1445_vm4 }
 0x175   : > { %v1299_v23 = vadd.f32 %v2463_v24, %v1282_v17  ;;  %v1959_v33 = vpop.f32.mrf.mxu1  ;;  %v1484_v18 = vsel %vm2660_vm3, %v1474_v25, %v2618_v61  ;;  %v921_v13 = vadd.f32 %v2412_v22, %v2345_v16 }
 0x176   : > { %v1554_v40 = vadd.f32 %v1553_v26, %v1545_v31  ;;  %v1258_v21 = vpop.f32.mrf.mxu0  ;;  %v1475_v31 = vadd.s32 10, %v1433_v5  ;;  %vm1494_vm8 = vcmp.lt.s32.totalorder %v1484_v18, 8 }
 0x177   : > { %1309 = vst [vmem:[%s2488_s20 + $0x20] sm:$0xff] %v1299_v23  ;;  %v1520_v58 = vsel %vm2597_vm10, %v1299_v23, 0.0  ;;  %v1144_v19 = vpop.f32.mrf.mxu1  ;;  %v1283_v60 = vadd.f32 %v1258_v21, %v1161_v56  ;;  %v1043_v43 = vadd.f32 %v2442_v62, %v921_v13 }
 0x178   : > { %v1529_v36 = vadd.f32 %v1528_v15, %v1520_v58  ;;  %v1546_v50 = vmul.f32 %v1520_v58, %v1520_v58  ;;  %v1978_v14 = vpop.f32.mrf.mxu0  ;;  %v1163_v45 = vadd.f32 %v1144_v19, %v1041_v59 }
 0x179   : > { %v1300_v52 = vadd.f32 %v2463_v24, %v1283_v60  ;;  %v1960_v57 = vpop.f32.mrf.mxu1 }
 0x17a   : > { %v1555_v28 = vadd.f32 %v1554_v40, %v1546_v50  ;;  %v1263_v41 = vpop.f32.mrf.mxu0  ;;  %v1485_v40 = vsel %vm2673_vm7, %v1475_v31, %v1433_v5 }
 0x17b   : > { %1310 = vst [vmem:[%s2488_s20 + $0x28] sm:$0xff] %v1300_v52  ;;  %v1521_v46 = vsel %vm2625_vm14, %v1300_v52, 0.0  ;;  %v1149_v30 = vpop.f32.mrf.mxu1  ;;  %v1284_v37 = vadd.f32 %v1263_v41, %v1162_v53  ;;  %vm1495_vm9 = vcmp.lt.s32.totalorder %v1485_v40, 8 }
 0x17c   : > { %v1530_v7 = vadd.f32 %v1529_v36, %v1521_v46  ;;  %v1547_v42 = vmul.f32 %v1521_v46, %v1521_v46  ;;  %v1981_v38 = vpop.f32.mrf.mxu0  ;;  %v1164_v17 = vadd.f32 %v1149_v30, %v1042_v12 }
 0x17d   : > { %v1301_v4 = vadd.f32 %v2463_v24, %v1284_v37  ;;  %v1963_v6 = vpop.f32.mrf.mxu1 }
 0x17e   : > { %v1556_v26 = vadd.f32 %v1555_v28, %v1547_v42  ;;  %v1266_v44 = vpop.f32.mrf.mxu0 }
 0x17f   : > { %1311 = vst [vmem:[%s2488_s20 + $0x30] sm:$0xff] %v1301_v4  ;;  %v1522_v0 = vsel %vm1492_vm2, %v1301_v4, 0.0  ;;  %v1152_v27 = vpop.f32.mrf.mxu1  ;;  %v1285_v2 = vadd.f32 %v1266_v44, %v1163_v45 }
 0x180   : > { %v1531_v11 = vadd.f32 %v1530_v7, %v1522_v0  ;;  %v1548_v55 = vmul.f32 %v1522_v0, %v1522_v0  ;;  %v1982_v39 = vpop.f32.mrf.mxu0  ;;  %v1165_v29 = vadd.f32 %v1152_v27, %v1043_v43 }
 0x181   : > { %v1302_v35 = vadd.f32 %v2463_v24, %v1285_v2  ;;  %v1964_v15 = vpop.f32.mrf.mxu1 }
 0x182   : > { %v1557_v1 = vadd.f32 %v1556_v26, %v1548_v55  ;;  %v1271_v63 = vpop.f32.mrf.mxu0 }
 0x183   : > { %1312 = vst [vmem:[%s2488_s20 + $0x38] sm:$0xff] %v1302_v35  ;;  %v1523_v56 = vsel %vm1493_vm6, %v1302_v35, 0.0  ;;  %v1286_v23 = vadd.f32 %v1271_v63, %v1164_v17 }
 0x184   : > { %v1532_v33 = vadd.f32 %v1531_v11, %v1523_v56  ;;  %v1549_v16 = vmul.f32 %v1523_v56, %v1523_v56  ;;  %v1985_v22 = vpop.f32.mrf.mxu0 }
 0x185   : > { %v1303_v34 = vadd.f32 %v2463_v24, %v1286_v23 }
 0x186   : > { %v1558_v21 = vadd.f32 %v1557_v1, %v1549_v16  ;;  %v1274_v61 = vpop.f32.mrf.mxu0 }
 0x187   : > { %1313 = vst [vmem:[%s2488_s20 + $0x40] sm:$0xff] %v1303_v34  ;;  %v1524_v47 = vsel %vm1494_vm8, %v1303_v34, 0.0  ;;  %v1287_v10 = vadd.f32 %v1274_v61, %v1165_v29 }
 0x188   : > { %v1533_v62 = vadd.f32 %v1532_v33, %v1524_v47  ;;  %v1550_v58 = vmul.f32 %v1524_v47, %v1524_v47  ;;  %v1986_v19 = vpop.f32.mrf.mxu0 }
 0x189   : > { %v1304_v60 = vadd.f32 %v2463_v24, %v1287_v10 }
 0x18a   : > { %v1559_v36 = vadd.f32 %v1558_v21, %v1550_v58 }
 0x18b   : > { %1314 = vst [vmem:[%s2488_s20 + $0x48] sm:$0xff] %v1304_v60  ;;  %v1525_v50 = vsel %vm1495_vm9, %v1304_v60, 0.0 }
 0x18c   : > { %v1534_v48 = vadd.f32 %v1533_v62, %v1525_v50  ;;  %v1551_v14 = vmul.f32 %v1525_v50, %v1525_v50 }
 0x18e   : > { %v1535_v3 = vrot.slane %v1534_v48, 4  ;;  %v1560_v51 = vadd.f32 %v1559_v36, %v1551_v14 }
 0x190   : > { %v1536_v53 = vadd.f32 %v1535_v3, %v1534_v48  ;;  %v1561_v52 = vrot.slane %v1560_v51, 4 }
 0x192   : > { %v1537_v57 = vrot.slane %v1536_v53, 2  ;;  %v1562_v54 = vadd.f32 %v1561_v52, %v1560_v51 }
 0x194   : > { %v1538_v28 = vadd.f32 %v1537_v57, %v1536_v53  ;;  %v1563_v41 = vrot.slane %v1562_v54, 2 }
 0x196   : > { %v1539_v49 = vrot.slane %v1538_v28, 1  ;;  %v1564_v5 = vadd.f32 %v1563_v41, %v1562_v54 }
 0x198   : > { %v1540_v24 = vadd.f32 %v1539_v49, %v1538_v28  ;;  %v1565_v59 = vrot.slane %v1564_v5, 1 }
 0x19a   : > { %1541 = vst [vmem:[%s208_s24] sm:$0x1] %v1540_v24  ;;  %v1566_v46 = vadd.f32 %v1565_v59, %v1564_v5 }
 0x19c   : > { %1567 = vst [vmem:[%s208_s24 + $0x1] sm:$0x1] %v1566_v46 }
 0x19d PF: > { %s15_s15 = sadd.s32 1, %s2036_s15  }
 0x19e   : > { %p12_p4 = scmp.ge.s32.totalorder %s15_s15, 6  }
 0x1a0   :  { %14 = sbr.rel (!%p12_p4) target bundleno = 1 (0x1), region = 82 }

// kernel: conv_capsule_forward.3
= control target key start
LH: loop header
LB: loop body
LE: loop exit
PB: predicated region body
PF: predicated region fallthrough
CT: control target
= control target key end

     0   :  { %s614_s6 = smov 0   ;;  %s616_s7 = smov 0   ;;  %s783_s0 = inlined_call_operand.vmem [shape: f32[3,2,4,4,128], index: 0, kind: input, shape index: {}]   ;;  %s784_s1 = inlined_call_operand.vmem [shape: f32[3,4,4,128], index: 1, kind: output, shape index: {}]  }
   0x1   :  { %s618_s8 = smov 0  }
   0x2 LB: > { %s23_s9 = sadd.s32 1, %s598_s7  ;;  %p503_p0 = scmp.ge.s32.totalorder %s602_s8, 1  ;;  %s602_s8 = sphi %s618_s8, %s11_s8   ;;  %s598_s7 = sphi %s616_s7, %s786_s7   ;;  %s594_s6 = sphi %s614_s6, %s785_s6  }
   0x3   : > { %p25_p1 = scmp.ge.s32.totalorder %s23_s9, 3  ;;  %p106_p2 = scmp.lt.s32.totalorder %s602_s8, 4 }
   0x5   : > { %s788_s9 = smov (%p25_p1, %s23_s9), 0  ;;  %p107_p3 = pnand %p503_p0, %p106_p2 }
   0x6   : > { %p132_p4 = scmp.lt.s32.totalorder (!%p107_p3), %s594_s6, 2 }
   0x7   : > { %110 = sbr.rel (%p107_p3) target bundleno = 164 (0xa4), region = 24 }
   0xc   : > { %s790_s6 = smov (!%p132_p4, %s594_s6), 2  ;;  %vm156_vm0 = vcmask 1043456  }
   0xd   : > { %s510_s10 = sshll.u32 %s790_s6, 5  ;;  %s511_s14 = sshll.u32 %s790_s6, 4 }
   0xe   : > { %s139_s13 = scalar_lea.vmem %s783_s0, %s510_s10  ;;  %s147_s17 = scalar_lea.vmem %s784_s1, %s511_s14 }
   0xf   : > { %v638_v0 = vld [vmem:[%s139_s13] sm:$0xf]  ;;  %v640_v1 = vld [vmem:[%s139_s13 + $0x4] sm:$0xf]  ;;  %v642_v2 = vld [vmem:[%s139_s13 + $0x8] sm:$0xf] }
  0x10   : > { %v644_v3 = vld [vmem:[%s139_s13 + $0xc] sm:$0xf]  ;;  %v646_v4 = vld [vmem:[%s139_s13 + $0x10] sm:$0xf]  ;;  %v648_v5 = vld [vmem:[%s139_s13 + $0x14] sm:$0xf]  ;;  %v233_v43 = vmul.f32 %v638_v0, %v638_v0  ;;  %v234_v44 = vmul.f32 %v640_v1, %v640_v1  ;;  %v235_v46 = vmul.f32 %v642_v2, %v642_v2 }
  0x11   : > { %v650_v6 = vld [vmem:[%s139_s13 + $0x18] sm:$0xf]  ;;  %v157_v7 = vsel %vm156_vm0, %v638_v0, 0.0  ;;  %v158_v8 = vsel %vm156_vm0, %v646_v4, 0.0  ;;  %v656_v9 = vld [vmem:[%s139_s13 + $0x1c] sm:$0xf]  ;;  %v236_v47 = vmul.f32 %v644_v3, %v644_v3  ;;  %v237_v48 = vmul.f32 %v646_v4, %v646_v4 }
  0x12   : > { %v159_v10 = vadd.f32 %v158_v8, %v157_v7  ;;  %v160_v11 = vsel %vm156_vm0, %v640_v1, 0.0  ;;  %v161_v12 = vsel %vm156_vm0, %v648_v5, 0.0  ;;  %v163_v13 = vsel %vm156_vm0, %v642_v2, 0.0 }
  0x13   : > { %v162_v14 = vadd.f32 %v161_v12, %v160_v11  ;;  %v164_v15 = vsel %vm156_vm0, %v650_v6, 0.0  ;;  %v166_v16 = vsel %vm156_vm0, %v644_v3, 0.0  ;;  %v167_v17 = vsel %vm156_vm0, %v656_v9, 0.0 }
  0x14   : > { %v165_v18 = vadd.f32 %v164_v15, %v163_v13  ;;  %v168_v19 = vadd.f32 %v167_v17, %v166_v16  ;;  %v169_v20 = vmul.f32 %v159_v10, %v638_v0  ;;  %v173_v24 = vmul.f32 %v159_v10, %v646_v4 }
  0x15   : > { %v170_v21 = vmul.f32 %v162_v14, %v640_v1  ;;  %v174_v25 = vmul.f32 %v162_v14, %v648_v5  ;;  %v238_v51 = vmul.f32 %v648_v5, %v648_v5  ;;  %v239_v52 = vmul.f32 %v650_v6, %v650_v6 }
  0x16   : > { %v171_v22 = vmul.f32 %v165_v18, %v642_v2  ;;  %v172_v23 = vmul.f32 %v168_v19, %v644_v3  ;;  %v177_v26 = vsel %vm156_vm0, %v169_v20, 0.0  ;;  %v175_v28 = vmul.f32 %v165_v18, %v650_v6 }
  0x17   : > { %v184_v27 = vsel %vm156_vm0, %v170_v21, 0.0  ;;  %v178_v29 = vrot.slane %v177_v26, 4  ;;  %v205_v33 = vsel %vm156_vm0, %v173_v24, 0.0  ;;  %v212_v34 = vsel %vm156_vm0, %v174_v25, 0.0 }
  0x18   : > { %v191_v30 = vsel %vm156_vm0, %v171_v22, 0.0  ;;  %v198_v31 = vsel %vm156_vm0, %v172_v23, 0.0  ;;  %v185_v32 = vrot.slane %v184_v27, 4  ;;  %v176_v35 = vmul.f32 %v168_v19, %v656_v9 }
  0x19   : > { %v192_v36 = vrot.slane %v191_v30, 4  ;;  %v199_v37 = vrot.slane %v198_v31, 4  ;;  %v684_v38 = vadd.f32 %v178_v29, %v177_v26  ;;  %v206_v39 = vrot.slane %v205_v33, 4 }
  0x1a   : > { %v213_v40 = vrot.slane %v212_v34, 4  ;;  %v219_v41 = vsel %vm156_vm0, %v175_v28, 0.0  ;;  %v687_v42 = vadd.f32 %v185_v32, %v184_v27  ;;  %v694_v45 = vsel %vm156_vm0, %v176_v35, 0.0 }
  0x1b   : > { %v702_v49 = vadd.f32 %v192_v36, %v191_v30  ;;  %v220_v50 = vrot.slane %v219_v41, 4  ;;  %v180_v53 = vrot.slane %v684_v38, 2  ;;  %v709_v54 = vadd.f32 %v199_v37, %v198_v31 }
  0x1c   : > { %v711_v55 = vadd.f32 %v206_v39, %v205_v33  ;;  %v713_v56 = vadd.f32 %v213_v40, %v212_v34  ;;  %v187_v57 = vrot.slane %v687_v42, 2  ;;  %v227_v58 = vrot.slane %v694_v45, 4 }
  0x1d   : > { %v240_v59 = vmul.f32 %v656_v9, %v656_v9  ;;  %v241_v60 = vsel %vm156_vm0, %v233_v43, 0.0  ;;  %v248_v62 = vsel %vm156_vm0, %v234_v44, 0.0  ;;  %v255_v63 = vsel %vm156_vm0, %v235_v46, 0.0 }
  0x1e   : > { %v242_v61 = vrot.slane %v241_v60, 4  ;;  %v262_v7 = vsel %vm156_vm0, %v236_v47, 0.0  ;;  %v194_v8 = vrot.slane %v702_v49, 2  ;;  %v724_v10 = vadd.f32 %v220_v50, %v219_v41 }
  0x1f   : > { %v249_v11 = vrot.slane %v248_v62, 4  ;;  %v256_v12 = vrot.slane %v255_v63, 4  ;;  %v263_v14 = vrot.slane %v262_v7, 4  ;;  %v269_v15 = vsel %vm156_vm0, %v237_v48, 0.0 }
  0x20   : > { %v243_v13 = vadd.f32 %v242_v61, %v241_v60  ;;  %v276_v16 = vsel %vm156_vm0, %v238_v51, 0.0  ;;  %v270_v19 = vrot.slane %v269_v15, 4  ;;  %v283_v23 = vsel %vm156_vm0, %v239_v52, 0.0 }
  0x21   : > { %v250_v17 = vadd.f32 %v249_v11, %v248_v62  ;;  %v257_v18 = vadd.f32 %v256_v12, %v255_v63  ;;  %v277_v20 = vrot.slane %v276_v16, 4  ;;  %v264_v22 = vadd.f32 %v263_v14, %v262_v7 }
  0x22   : > { %v244_v21 = vrot.slane %v243_v13, 2  ;;  %v290_v24 = vsel %vm156_vm0, %v240_v59, 0.0  ;;  %v271_v27 = vadd.f32 %v270_v19, %v269_v15  ;;  %v284_v31 = vrot.slane %v283_v23, 4 }
  0x23   : > { %v251_v25 = vrot.slane %v250_v17, 2  ;;  %v258_v26 = vrot.slane %v257_v18, 2  ;;  %v278_v28 = vadd.f32 %v277_v20, %v276_v16  ;;  %v265_v30 = vrot.slane %v264_v22, 2 }
  0x24   : > { %v245_v29 = vadd.f32 %v244_v21, %v243_v13  ;;  %v291_v32 = vrot.slane %v290_v24, 4  ;;  %v272_v35 = vrot.slane %v271_v27, 2  ;;  %v285_v40 = vadd.f32 %v284_v31, %v283_v23 }
  0x25   : > { %v252_v33 = vadd.f32 %v251_v25, %v250_v17  ;;  %v259_v34 = vadd.f32 %v258_v26, %v257_v18  ;;  %v279_v36 = vrot.slane %v278_v28, 2  ;;  %v266_v39 = vadd.f32 %v265_v30, %v264_v22 }
  0x26   : > { %v246_v37 = vrot.slane %v245_v29, 1  ;;  %v292_v41 = vadd.f32 %v291_v32, %v290_v24  ;;  %v273_v46 = vadd.f32 %v272_v35, %v271_v27  ;;  %v286_v51 = vrot.slane %v285_v40, 2 }
  0x27   : > { %v253_v43 = vrot.slane %v252_v33, 1  ;;  %v260_v44 = vrot.slane %v259_v34, 1  ;;  %v280_v47 = vadd.f32 %v279_v36, %v278_v28  ;;  %v267_v50 = vrot.slane %v266_v39, 1 }
  0x28   : > { %v247_v48 = vadd.f32 %v246_v37, %v245_v29  ;;  %v293_v52 = vrot.slane %v292_v41, 2  ;;  %v274_v61 = vrot.slane %v273_v46, 1  ;;  %v287_v7 = vadd.f32 %v286_v51, %v285_v40 }
  0x29   : > { %v254_v59 = vadd.f32 %v253_v43, %v252_v33  ;;  %v261_v60 = vadd.f32 %v260_v44, %v259_v34  ;;  %v281_v62 = vrot.slane %v280_v47, 1  ;;  %v268_v63 = vadd.f32 %v267_v50, %v266_v39 }
  0x2a   : > { %v294_v11 = vadd.f32 %v293_v52, %v292_v41  ;;  %v297_v12 = vmax.f32 %v247_v48, 1e-08  ;;  %v275_v13 = vadd.f32 %v274_v61, %v273_v46  ;;  %v288_v17 = vrot.slane %v287_v7, 1 }
  0x2b   : > { %v282_v14 = vadd.f32 %v281_v62, %v280_v47  ;;  %v298_v15 = vmax.f32 %v254_v59, 1e-08  ;;  %v299_v16 = vmax.f32 %v261_v60, 1e-08  ;;  %v300_v19 = vmax.f32 %v268_v63, 1e-08 }
  0x2c   : > { %v295_v18 = vrot.slane %v294_v11, 1  ;;  %536 = vrcp.f32 %v297_v12  ;;  %v228_v20 = vadd.f32 %v227_v58, %v694_v45  ;;  %v301_v21 = vmax.f32 %v275_v13, 1e-08 }
  0x2d   : > { %v302_v22 = vmax.f32 %v282_v14, 1e-08  ;;  %538 = vrcp.f32 %v298_v15  ;;  %v208_v23 = vrot.slane %v711_v55, 2  ;;  %v289_v24 = vadd.f32 %v288_v17, %v287_v7 }
  0x2e   : > { %v296_v25 = vadd.f32 %v295_v18, %v294_v11  ;;  %540 = vrcp.f32 %v299_v16  ;;  %v181_v26 = vadd.f32 %v180_v53, %v684_v38  ;;  %v201_v27 = vrot.slane %v709_v54, 2 }
  0x2f   : > { %v215_v28 = vrot.slane %v713_v56, 2  ;;  %542 = vrcp.f32 %v300_v19  ;;  %v222_v29 = vrot.slane %v724_v10, 2  ;;  %v303_v45 = vmax.f32 %v289_v24, 1e-08 }
  0x30   : > { %v304_v58 = vmax.f32 %v296_v25, 1e-08  ;;  %544 = vrcp.f32 %v301_v21  ;;  %v188_v30 = vadd.f32 %v187_v57, %v687_v42  ;;  %v229_v31 = vrot.slane %v228_v20, 2 }
  0x31   : > { %546 = vrcp.f32 %v302_v22  ;;  %v195_v38 = vadd.f32 %v194_v8, %v702_v49  ;;  %v209_v53 = vadd.f32 %v208_v23, %v711_v55  ;;  %v202_v32 = vadd.f32 %v201_v27, %v709_v54 }
  0x32   : > { %548 = vrcp.f32 %v303_v45  ;;  %v216_v33 = vadd.f32 %v215_v28, %v713_v56  ;;  %v182_v34 = vrot.slane %v181_v26, 1  ;;  %v223_v35 = vadd.f32 %v222_v29, %v724_v10 }
  0x33   : > { %550 = vrcp.f32 %v304_v58  ;;  %v189_v36 = vrot.slane %v188_v30, 1  ;;  %v230_v37 = vadd.f32 %v229_v31, %v228_v20  ;;  %v196_v42 = vrot.slane %v195_v38, 1 }
  0x34   : > { %v210_v57 = vrot.slane %v209_v53, 1  ;;  %v203_v39 = vrot.slane %v202_v32, 1  ;;  %v217_v40 = vrot.slane %v216_v33, 1  ;;  %v183_v41 = vadd.f32 %v182_v34, %v181_v26 }
  0x35   : > { %v224_v43 = vrot.slane %v223_v35, 1  ;;  %v190_v8 = vadd.f32 %v189_v36, %v188_v30  ;;  %v231_v55 = vrot.slane %v230_v37, 1  ;;  %v197_v46 = vadd.f32 %v196_v42, %v195_v38 }
  0x36   : > { %v211_v54 = vadd.f32 %v210_v57, %v209_v53  ;;  %v204_v56 = vadd.f32 %v203_v39, %v202_v32  ;;  %v218_v48 = vadd.f32 %v217_v40, %v216_v33 }
  0x37   : > { %v225_v51 = vadd.f32 %v224_v43, %v223_v35  ;;  %v232_v59 = vadd.f32 %v231_v55, %v230_v37 }
  0x39   : > { %v537_v49 = vpop.eup %536 }
  0x3a   : > { %v539_v44 = vpop.eup %538  ;;  %v306_v10 = vmul.f32 %v537_v49, %v183_v41 }
  0x3b   : > { %v541_v47 = vpop.eup %540  ;;  %v308_v60 = vmul.f32 %v539_v44, %v190_v8 }
  0x3c   : > { %v543_v50 = vpop.eup %542  ;;  %v310_v62 = vmul.f32 %v541_v47, %v197_v46 }
  0x3d   : > { %v545_v52 = vpop.eup %544  ;;  %v312_v11 = vmul.f32 %v543_v50, %v204_v56 }
  0x3e   : > { %v547_v61 = vpop.eup %546  ;;  %v314_v63 = vmul.f32 %v545_v52, %v211_v54 }
  0x3f   : > { %v549_v7 = vpop.eup %548  ;;  %v316_v12 = vmul.f32 %v547_v61, %v218_v48 }
  0x40   : > { %v551_v13 = vpop.eup %550  ;;  %v318_v14 = vmul.f32 %v549_v7, %v225_v51  ;;  %v321_v15 = vmax.f32 %v306_v10, %v314_v63 }
  0x41   : > { %v320_v16 = vmul.f32 %v551_v13, %v232_v59  ;;  %v322_v17 = vmax.f32 %v308_v60, %v316_v12 }
  0x42   : > { %v323_v18 = vmax.f32 %v310_v62, %v318_v14  ;;  %v325_v19 = vsub.f32 %v306_v10, %v321_v15  ;;  %v329_v20 = vsub.f32 %v314_v63, %v321_v15 }
  0x43   : > { %v324_v21 = vmax.f32 %v312_v11, %v320_v16  ;;  %v326_v22 = vsub.f32 %v308_v60, %v322_v17  ;;  %v330_v23 = vsub.f32 %v316_v12, %v322_v17 }
  0x44   : > { %v327_v24 = vsub.f32 %v310_v62, %v323_v18  ;;  %v331_v25 = vsub.f32 %v318_v14, %v323_v18  ;;  %v333_v26 = vmul.f32 1.442695, %v325_v19  ;;  %v341_v58 = vmul.f32 1.442695, %v329_v20 }
  0x45   : > { %v328_v27 = vsub.f32 %v312_v11, %v324_v21  ;;  %v332_v28 = vsub.f32 %v320_v16, %v324_v21  ;;  %v335_v29 = vmul.f32 1.442695, %v326_v22  ;;  %v343_v31 = vmul.f32 1.442695, %v330_v23 }
  0x46   : > { %552 = vpow2.f32 %v333_v26  ;;  %v337_v45 = vmul.f32 1.442695, %v327_v24  ;;  %v345_v38 = vmul.f32 1.442695, %v331_v25 }
  0x47   : > { %554 = vpow2.f32 %v335_v29  ;;  %v339_v30 = vmul.f32 1.442695, %v328_v27  ;;  %v347_v53 = vmul.f32 1.442695, %v332_v28 }
  0x48   : > { %556 = vpow2.f32 %v337_v45 }
  0x49   : > { %558 = vpow2.f32 %v339_v30 }
  0x4a   : > { %560 = vpow2.f32 %v341_v58 }
  0x4b   : > { %562 = vpow2.f32 %v343_v31 }
  0x4c   : > { %564 = vpow2.f32 %v345_v38 }
  0x4d   : > { %566 = vpow2.f32 %v347_v53 }
  0x53   : > { %v553_v32 = vpop.eup %552 }
  0x54   : > { %v555_v33 = vpop.eup %554 }
  0x55   : > { %v557_v34 = vpop.eup %556 }
  0x56   : > { %v559_v35 = vpop.eup %558 }
  0x57   : > { %v561_v36 = vpop.eup %560 }
  0x58   : > { %v563_v37 = vpop.eup %562  ;;  %v349_v42 = vadd.f32 %v561_v36, %v553_v32 }
  0x59   : > { %v565_v57 = vpop.eup %564  ;;  %v350_v39 = vadd.f32 %v563_v37, %v555_v33 }
  0x5a   : > { %v567_v40 = vpop.eup %566  ;;  %v351_v41 = vadd.f32 %v565_v57, %v557_v34  ;;  %568 = vrcp.f32 %v349_v42 }
  0x5b   : > { %v352_v43 = vadd.f32 %v567_v40, %v559_v35  ;;  %570 = vrcp.f32 %v350_v39 }
  0x5c   : > { %572 = vrcp.f32 %v351_v41 }
  0x5d   : > { %574 = vrcp.f32 %v352_v43 }
  0x67   : > { %v569_v49 = vpop.eup %568 }
  0x68   : > { %v571_v8 = vpop.eup %570  ;;  %v357_v55 = vmul.f32 %v569_v49, %v553_v32  ;;  %v361_v44 = vmul.f32 %v569_v49, %v561_v36 }
  0x69   : > { %v573_v46 = vpop.eup %572  ;;  %v358_v54 = vmul.f32 %v571_v8, %v555_v33  ;;  %v362_v47 = vmul.f32 %v571_v8, %v563_v37 }
  0x6a   : > { %v575_v56 = vpop.eup %574  ;;  %v359_v48 = vmul.f32 %v573_v46, %v557_v34  ;;  %v363_v50 = vmul.f32 %v573_v46, %v565_v57  ;;  %v365_v51 = vmul.f32 %v357_v55, %v638_v0  ;;  %v369_v10 = vmul.f32 %v361_v44, %v646_v4 }
  0x6b   : > { %v360_v52 = vmul.f32 %v575_v56, %v559_v35  ;;  %v364_v59 = vmul.f32 %v575_v56, %v567_v40  ;;  %v366_v60 = vmul.f32 %v358_v54, %v640_v1  ;;  %v370_v61 = vmul.f32 %v362_v47, %v648_v5 }
  0x6c   : > { %v367_v62 = vmul.f32 %v359_v48, %v642_v2  ;;  %v371_v63 = vmul.f32 %v363_v50, %v650_v6  ;;  %v373_v7 = vsel %vm156_vm0, %v365_v51, 0.0  ;;  %v374_v11 = vsel %vm156_vm0, %v369_v10, 0.0 }
  0x6d   : > { %v368_v12 = vmul.f32 %v360_v52, %v644_v3  ;;  %v372_v0 = vmul.f32 %v364_v59, %v656_v9  ;;  %v375_v13 = vadd.f32 %v374_v11, %v373_v7  ;;  %v376_v4 = vsel %vm156_vm0, %v366_v60, 0.0 }
  0x6e   : > { %v377_v14 = vsel %vm156_vm0, %v370_v61, 0.0  ;;  %v379_v1 = vsel %vm156_vm0, %v367_v62, 0.0  ;;  %v380_v5 = vsel %vm156_vm0, %v371_v63, 0.0 }
  0x6f   : > { %v378_v2 = vadd.f32 %v377_v14, %v376_v4  ;;  %v381_v15 = vadd.f32 %v380_v5, %v379_v1  ;;  %v382_v6 = vsel %vm156_vm0, %v368_v12, 0.0  ;;  %v383_v16 = vsel %vm156_vm0, %v372_v0, 0.0 }
  0x70   : > { %v384_v17 = vadd.f32 %v383_v16, %v382_v6  ;;  %v385_v18 = vmul.f32 %v375_v13, %v375_v13 }
  0x71   : > { %v386_v3 = vmul.f32 %v378_v2, %v378_v2  ;;  %v387_v19 = vmul.f32 %v381_v15, %v381_v15 }
  0x72   : > { %v388_v9 = vmul.f32 %v384_v17, %v384_v17  ;;  %v389_v20 = vsel %vm156_vm0, %v385_v18, 0.0 }
  0x73   : > { %v390_v21 = vsel %vm156_vm0, %v386_v3, 0.0  ;;  %v392_v22 = vsel %vm156_vm0, %v387_v19, 0.0 }
  0x74   : > { %v391_v23 = vadd.f32 %v390_v21, %v389_v20  ;;  %v394_v24 = vsel %vm156_vm0, %v388_v9, 0.0 }
  0x76   : > { %v393_v25 = vadd.f32 %v392_v22, %v391_v23 }
  0x78   : > { %v395_v26 = vadd.f32 %v394_v24, %v393_v25 }
  0x7a   : > { %576 = vrsqrt.f32 %v395_v26  ;;  %vm398_vm1 = vcmp.eq.f32.partialorder %v395_v26, inf  ;;  %v401_v28 = vand.u32 2147483648, %v395_v26  ;;  %vm400_vm2 = vcmp.eq.f32.partialorder %v395_v26, 0.0 }
  0x7b   : > { %v403_v58 = vadd.f32 1.0, %v395_v26 }
  0x87   : > { %v577_v27 = vpop.eup %576 }
  0x88   : > { %v397_v29 = vmul.f32 %v577_v27, %v395_v26 }
  0x8a   : > { %v399_v45 = vsel %vm398_vm1, %v395_v26, %v397_v29 }
  0x8b   : > { %v402_v30 = vsel %vm400_vm2, %v401_v28, %v399_v45 }
  0x8c   : > { %v404_v31 = vadd.f32 1e-08, %v402_v30 }
  0x8e   : > { %v405_v38 = vmul.f32 %v404_v31, %v403_v58 }
  0x90   : > { %578 = vrcp.f32 %v405_v38 }
  0x9d   : > { %v579_v53 = vpop.eup %578 }
  0x9e   : > { %v407_v32 = vmul.f32 %v579_v53, %v395_v26 }
  0xa0   : > { %v408_v33 = vmul.f32 %v407_v32, %v375_v13  ;;  %v409_v34 = vmul.f32 %v407_v32, %v378_v2  ;;  %v410_v35 = vmul.f32 %v407_v32, %v381_v15  ;;  %v411_v36 = vmul.f32 %v407_v32, %v384_v17 }
  0xa2   : > { %412 = vst [vmem:[%s147_s17] sm:$0xf] %v408_v33  ;;  %413 = vst [vmem:[%s147_s17 + $0x4] sm:$0xf] %v409_v34 }
  0xa3   : > { %414 = vst [vmem:[%s147_s17 + $0x8] sm:$0xf] %v410_v35  ;;  %415 = vst [vmem:[%s147_s17 + $0xc] sm:$0xf] %v411_v36 }
  0xa4 PF: > { %s11_s8 = sadd.s32 1, %s602_s8   ;;  %s785_s6 = smov %s598_s7 }
  0xa5   : > { %p8_p5 = scmp.ge.s32.totalorder %s11_s8, 5   ;;  %s786_s7 = smov %s788_s9 }
  0xa7   :  { %10 = sbr.rel (!%p8_p5) target bundleno = 2 (0x2), region = 54 }

</bundles_post_ra>
